<compile_context>
chip_gen: v7x
topology: tpu7x:2x2x1
jax: 0.10.0
libtpu: 0.0.40
codegen_flags: <defaults>
</compile_context>

<pallas_src>
import math

import jax
import jax.numpy as jnp
from jax.experimental import pallas as pl
from jax.experimental.pallas import tpu as pltpu

EPS_BN = 1e-5  # nn.BatchNorm1d default eps


# ----------------------------- fused Pallas kernel -------------------------- #

def make_fused_vae_kernel(n_enc, n_dec, n_cont, cat_dims, latent_dim):
    """Builds the fused forward kernel for a given VAE topology.

    Ref order (inputs): x_emb, eps,
                        [enc_wT, enc_bnp] * n_enc,
                        enc_out_wT, enc_out_b,
                        [dec_wT, dec_bnp] * n_dec,
                        head_wT, head_b
    Ref order (outputs): xhat_concat, mu, log_var
    """

    def kernel(*refs):
        it = iter(refs)
        x_ref = next(it)
        eps_ref = next(it)
        enc = [(next(it), next(it)) for _ in range(n_enc)]
        eo_wT, eo_b = next(it), next(it)
        dec = [(next(it), next(it)) for _ in range(n_dec)]
        hd_wT, hd_b = next(it), next(it)
        xhat_ref, mu_ref, lv_ref = next(it), next(it), next(it)

        def block(h, wT_ref, p_ref):
            # Linear (bias dropped: exactly cancelled by GBN mean subtraction)
            h = jnp.dot(h, wT_ref[...], preferred_element_type=jnp.float32)
            # GBN, single virtual batch (batch <= 128) == train-mode BatchNorm1d
            mean = jnp.mean(h, axis=0, keepdims=True)
            var = jnp.mean((h - mean) ** 2, axis=0, keepdims=True)
            hn = (h - mean) * jax.lax.rsqrt(var + EPS_BN)
            hn = hn * p_ref[0:1, :] + p_ref[1:2, :]           # gamma, beta
            return jnp.where(hn >= 0, hn, p_ref[2:3, :] * hn)  # PReLU alpha

        # ----- encoder -----
        h = x_ref[...]
        for wT, p in enc:
            h = block(h, wT, p)
        encoded = jnp.dot(h, eo_wT[...], preferred_element_type=jnp.float32) + eo_b[...]
        mu = encoded[:, :latent_dim]
        log_var = encoded[:, latent_dim:2 * latent_dim]
        mu_ref[...] = mu
        lv_ref[...] = log_var

        # ----- reparameterize: z = eps * exp(0.5*log_var) + mu -----
        z = eps_ref[...] * jnp.exp(0.5 * log_var) + mu

        # ----- decoder -----
        h = z
        for wT, p in dec:
            h = block(h, wT, p)

        # ----- merged output heads: one matmul, per-segment log-softmax -----
        logits = jnp.dot(h, hd_wT[...], preferred_element_type=jnp.float32) + hd_b[...]
        off = 0
        if n_cont:
            xhat_ref[:, 0:n_cont] = logits[:, 0:n_cont]       # continuous head (identity)
            off = n_cont
        for n in cat_dims:                                    # LambdaLogSoftmax(dim=1)
            seg = logits[:, off:off + n]
            m = jnp.max(seg, axis=-1, keepdims=True)
            s = seg - m
            lse = jnp.log(jnp.sum(jnp.exp(s), axis=-1, keepdims=True))
            xhat_ref[:, off:off + n] = s - lse
            off += n

    return kernel


# ------------------------------- VAE (JAX) ---------------------------------- #

class VAEConfig:
    def __init__(self, categorical_features, categorical_dims, continuous_features,
                 latent_dim=8, hidden_dim=(32, 32, 32)):
        pairs = sorted(zip(categorical_features, categorical_dims))
        self.categorical_features = [p[0] for p in pairs]
        self.categorical_dims = [p[1] for p in pairs]
        self.continuous_features = sorted(continuous_features)
        self.latent_dim = latent_dim
        self.hidden_dim = list(hidden_dim)
        self.input_dim = len(continuous_features) + len(categorical_features)
        self.emb_dims = [min(600, round(1.6 * n ** 0.56)) for n in self.categorical_dims]
        self.post_embed_dim = self.input_dim - len(self.categorical_dims) + sum(self.emb_dims)


def _init_linear_t(key, in_dim, out_dim):
    # torch nn.Linear default init, stored pre-transposed: wT is (in, out).
    kw, kb = jax.random.split(key)
    bound = 1.0 / math.sqrt(in_dim)
    wT = jax.random.uniform(kw, (in_dim, out_dim), jnp.float32, -bound, bound)
    b = jax.random.uniform(kb, (1, out_dim), jnp.float32, -bound, bound)
    return wT, b


def _init_block(key, in_dim, out_dim):
    # Linear bias is omitted: it is mathematically cancelled by the GBN mean subtraction.
    wT, _unused_b = _init_linear_t(key, in_dim, out_dim)
    gamma = jnp.ones((out_dim,), jnp.float32)           # GBN scale
    beta = jnp.zeros((out_dim,), jnp.float32)           # GBN shift
    alpha = jnp.full((out_dim,), 0.25, jnp.float32)     # PReLU slope (per-channel)
    bnp = jnp.stack([gamma, beta, alpha], axis=0)       # packed (3, out_dim)
    return wT, bnp


def init_vae_params(key, cfg: VAEConfig):
    params = {}
    keys = iter(jax.random.split(key, 64))

    # embeddings for categorical columns
    params["emb"] = [jax.random.normal(next(keys), (n, d), jnp.float32)
                     for n, d in zip(cfg.categorical_dims, cfg.emb_dims)]

    # encoder: [post_embed_dim] + hidden_dim blocks, then Linear -> 2*latent
    enc_dims = [cfg.post_embed_dim] + cfg.hidden_dim
    params["enc_blocks"] = [_init_block(next(keys), enc_dims[i - 1], enc_dims[i])
                            for i in range(1, len(enc_dims))]
    params["enc_out"] = _init_linear_t(next(keys), enc_dims[-1], 2 * cfg.latent_dim)

    # decoder: hidden_dim chain reversed, starting from latent
    dec_chain = [cfg.post_embed_dim] + cfg.hidden_dim + [cfg.latent_dim]
    params["dec_blocks"] = [_init_block(next(keys), dec_chain[i], dec_chain[i - 1])
                            for i in range(len(dec_chain) - 1, 1, -1)]

    # merged output heads: continuous head followed by all categorical heads,
    # concatenated along the output dim (decode() order: cont first, then cats).
    head_in = cfg.hidden_dim[0]
    head_wT_parts, head_b_parts = [], []
    if cfg.continuous_features:
        wT, b = _init_linear_t(next(keys), head_in, len(cfg.continuous_features))
        head_wT_parts.append(wT)
        head_b_parts.append(b)
    for n in cfg.categorical_dims:
        wT, b = _init_linear_t(next(keys), head_in, n)
        head_wT_parts.append(wT)
        head_b_parts.append(b)
    params["head"] = (jnp.concatenate(head_wT_parts, axis=1),
                      jnp.concatenate(head_b_parts, axis=1))
    return params


def embed_inputs(params, cfg: VAEConfig, x):
    """EmbeddingGenerator.forward: categorical columns -> embeddings, continuous pass-through."""
    cols = []
    cat_c = 0
    for i in range(cfg.input_dim):
        if i in cfg.categorical_features:
            idx = x[:, i].astype(jnp.int32)
            cols.append(jnp.take(params["emb"][cat_c], idx, axis=0))
            cat_c += 1
        else:
            cols.append(x[:, i:i + 1])
    return jnp.concatenate(cols, axis=1)


def vae_forward(params, cfg: VAEConfig, x, noise_key):
    batch = x.shape[0]
    assert batch <= 128, "GBN single-virtual-batch assumption (virtual_batch_size=128)"

    # embedding gather stays in JAX; everything downstream runs in one fused kernel
    h = embed_inputs(params, cfg, x)
    eps = jax.random.normal(noise_key, (batch, cfg.latent_dim), jnp.float32)  # torch.randn_like

    inputs = [h, eps]
    for wT, bnp in params["enc_blocks"]:
        inputs += [wT, bnp]
    inputs += list(params["enc_out"])
    for wT, bnp in params["dec_blocks"]:
        inputs += [wT, bnp]
    inputs += list(params["head"])

    n_cont = len(cfg.continuous_features)
    total_out = n_cont + sum(cfg.categorical_dims)

    kernel = make_fused_vae_kernel(
        n_enc=len(params["enc_blocks"]),
        n_dec=len(params["dec_blocks"]),
        n_cont=n_cont,
        cat_dims=list(cfg.categorical_dims),
        latent_dim=cfg.latent_dim,
    )

    vmem = pl.BlockSpec(memory_space=pltpu.MemorySpace.VMEM)
    xhat_all, mu, log_var = pl.pallas_call(
        kernel,
        out_shape=(
            jax.ShapeDtypeStruct((batch, total_out), jnp.float32),
            jax.ShapeDtypeStruct((batch, cfg.latent_dim), jnp.float32),
            jax.ShapeDtypeStruct((batch, cfg.latent_dim), jnp.float32),
        ),
        in_specs=[vmem] * len(inputs),
        out_specs=(vmem, vmem, vmem),
    )(*inputs)

    # split concatenated head output back into the torch-style list [cont, cat0, cat1, ...]
    x_hat = []
    off = 0
    if n_cont:
        x_hat.append(xhat_all[:, :n_cont])
        off = n_cont
    for n in cfg.categorical_dims:
        x_hat.append(xhat_all[:, off:off + n])
        off += n
    return x_hat, mu, log_var


# --------------------------------- main ------------------------------------- #

if __name__ == "__main__":
    cfg = VAEConfig(
        categorical_features=[1, 3],
        categorical_dims=[3, 5],
        continuous_features=[0, 2, 4, 5],
        latent_dim=8,
        hidden_dim=(32, 32, 32),
    )

    root = jax.random.PRNGKey(0)
    k_params, k_cont, k_cat1, k_cat2, k_noise = jax.random.split(root, 5)

    params = init_vae_params(k_params, cfg)

    # build the input batch (batch=8, input_dim=6): continuous columns ~ N(0,1),
    # categorical columns hold integer category ids stored as floats (torch.Tensor semantics)
    batch = 8
    x = jnp.zeros((batch, cfg.input_dim), jnp.float32)
    cont_vals = jax.random.normal(k_cont, (batch, len(cfg.continuous_features)), jnp.float32)
    for c, col in enumerate(cfg.continuous_features):
        x = x.at[:, col].set(cont_vals[:, c])
    cat_keys = [k_cat1, k_cat2]
    for kc, col, ncat in zip(cat_keys, cfg.categorical_features, cfg.categorical_dims):
        ids = jax.random.randint(kc, (batch,), 0, ncat)
        x = x.at[:, col].set(ids.astype(jnp.float32))

    x_hat, mu, log_var = vae_forward(params, cfg, x, k_noise)
    jax.block_until_ready((x_hat, mu, log_var))

    # sanity checks on shapes and log-softmax normalization
    assert x_hat[0].shape == (batch, len(cfg.continuous_features))
    assert x_hat[1].shape == (batch, cfg.categorical_dims[0])
    assert x_hat[2].shape == (batch, cfg.categorical_dims[1])
    assert mu.shape == (batch, cfg.latent_dim)
    assert log_var.shape == (batch, cfg.latent_dim)
    for cat_out in x_hat[1:]:
        sums = jnp.sum(jnp.exp(cat_out), axis=1)
        assert bool(jnp.all(jnp.abs(sums - 1.0) < 1e-4)), "log-softmax rows must sum to 1"

    print("KERNEL_OK")
</pallas_src>

<mosaic_0001>
module attributes {stable_mosaic.version = 11 : i64} {
  func.func @kernel(%arg0: memref<8x11xf32, #tpu.memory_space<vmem>>, %arg1: memref<8x8xf32, #tpu.memory_space<vmem>>, %arg2: memref<11x32xf32, #tpu.memory_space<vmem>>, %arg3: memref<3x32xf32, #tpu.memory_space<vmem>>, %arg4: memref<32x32xf32, #tpu.memory_space<vmem>>, %arg5: memref<3x32xf32, #tpu.memory_space<vmem>>, %arg6: memref<32x32xf32, #tpu.memory_space<vmem>>, %arg7: memref<3x32xf32, #tpu.memory_space<vmem>>, %arg8: memref<32x16xf32, #tpu.memory_space<vmem>>, %arg9: memref<1x16xf32, #tpu.memory_space<vmem>>, %arg10: memref<8x32xf32, #tpu.memory_space<vmem>>, %arg11: memref<3x32xf32, #tpu.memory_space<vmem>>, %arg12: memref<32x32xf32, #tpu.memory_space<vmem>>, %arg13: memref<3x32xf32, #tpu.memory_space<vmem>>, %arg14: memref<32x32xf32, #tpu.memory_space<vmem>>, %arg15: memref<3x32xf32, #tpu.memory_space<vmem>>, %arg16: memref<32x12xf32, #tpu.memory_space<vmem>>, %arg17: memref<1x12xf32, #tpu.memory_space<vmem>>, %arg18: memref<8x12xf32, #tpu.memory_space<vmem>>, %arg19: memref<8x8xf32, #tpu.memory_space<vmem>>, %arg20: memref<8x8xf32, #tpu.memory_space<vmem>>) attributes {dimension_semantics = [], scalar_prefetch = 0 : i64, scratch_operands = 0 : i64, tpu.core_type = #tpu.core_type<tc>} {
    %c0 = arith.constant 0 : index
    %c0_0 = arith.constant 0 : index
    %0 = vector.load %arg0[%c0, %c0_0] : memref<8x11xf32, #tpu.memory_space<vmem>>, vector<8x11xf32>
    %c0_1 = arith.constant 0 : index
    %c0_2 = arith.constant 0 : index
    %1 = vector.load %arg2[%c0_1, %c0_2] : memref<11x32xf32, #tpu.memory_space<vmem>>, vector<11x32xf32>
    %cst = arith.constant dense<0.000000e+00> : vector<8x32xf32>
    %2 = tpu.matmul %0, %1, %cst {dimension_numbers = #tpu.dot_dimension_numbers<[1], [0], [0], [1], [0, 0, 1, 1], [], []>} : vector<8x11xf32>, vector<11x32xf32>, vector<8x32xf32> -> vector<8x32xf32>
    %cst_3 = arith.constant dense<0.000000e+00> : vector<32xf32>
    %3 = vector.multi_reduction <add>, %2, %cst_3 [0] : vector<8x32xf32> to vector<32xf32>
    %4 = vector.shape_cast %3 : vector<32xf32> to vector<1x32xf32>
    %cst_4 = arith.constant 8.000000e+00 : f32
    %5 = vector.broadcast %cst_4 : f32 to vector<1x32xf32>
    %6 = arith.divf %4, %5 : vector<1x32xf32>
    %7 = vector.broadcast %6 : vector<1x32xf32> to vector<8x32xf32>
    %8 = arith.subf %2, %7 : vector<8x32xf32>
    %9 = arith.mulf %8, %8 : vector<8x32xf32>
    %cst_5 = arith.constant dense<0.000000e+00> : vector<32xf32>
    %10 = vector.multi_reduction <add>, %9, %cst_5 [0] : vector<8x32xf32> to vector<32xf32>
    %11 = vector.shape_cast %10 : vector<32xf32> to vector<1x32xf32>
    %cst_6 = arith.constant 8.000000e+00 : f32
    %12 = vector.broadcast %cst_6 : f32 to vector<1x32xf32>
    %13 = arith.divf %11, %12 : vector<1x32xf32>
    %14 = vector.broadcast %6 : vector<1x32xf32> to vector<8x32xf32>
    %15 = arith.subf %2, %14 : vector<8x32xf32>
    %cst_7 = arith.constant 9.99999974E-6 : f32
    %16 = vector.broadcast %cst_7 : f32 to vector<1x32xf32>
    %17 = arith.addf %13, %16 : vector<1x32xf32>
    %18 = math.rsqrt %17 : vector<1x32xf32>
    %19 = vector.broadcast %18 : vector<1x32xf32> to vector<8x32xf32>
    %20 = arith.mulf %15, %19 : vector<8x32xf32>
    %c0_8 = arith.constant 0 : index
    %c0_9 = arith.constant 0 : index
    %21 = vector.load %arg3[%c0_8, %c0_9] : memref<3x32xf32, #tpu.memory_space<vmem>>, vector<1x32xf32>
    %22 = vector.broadcast %21 : vector<1x32xf32> to vector<8x32xf32>
    %23 = arith.mulf %20, %22 : vector<8x32xf32>
    %c1 = arith.constant 1 : index
    %c0_10 = arith.constant 0 : index
    %24 = vector.load %arg3[%c1, %c0_10] : memref<3x32xf32, #tpu.memory_space<vmem>>, vector<1x32xf32>
    %25 = vector.broadcast %24 : vector<1x32xf32> to vector<8x32xf32>
    %26 = arith.addf %23, %25 : vector<8x32xf32>
    %cst_11 = arith.constant 0.000000e+00 : f32
    %27 = vector.broadcast %cst_11 : f32 to vector<8x32xf32>
    %28 = arith.cmpf oge, %26, %27 : vector<8x32xf32>
    %c2 = arith.constant 2 : index
    %c0_12 = arith.constant 0 : index
    %29 = vector.load %arg3[%c2, %c0_12] : memref<3x32xf32, #tpu.memory_space<vmem>>, vector<1x32xf32>
    %30 = vector.broadcast %29 : vector<1x32xf32> to vector<8x32xf32>
    %31 = arith.mulf %30, %26 : vector<8x32xf32>
    %32 = arith.select %28, %26, %31 : vector<8x32xi1>, vector<8x32xf32>
    %c0_13 = arith.constant 0 : index
    %c0_14 = arith.constant 0 : index
    %33 = vector.load %arg4[%c0_13, %c0_14] : memref<32x32xf32, #tpu.memory_space<vmem>>, vector<32x32xf32>
    %cst_15 = arith.constant dense<0.000000e+00> : vector<8x32xf32>
    %34 = tpu.matmul %32, %33, %cst_15 {dimension_numbers = #tpu.dot_dimension_numbers<[1], [0], [0], [1], [0, 0, 1, 1], [], []>} : vector<8x32xf32>, vector<32x32xf32>, vector<8x32xf32> -> vector<8x32xf32>
    %cst_16 = arith.constant dense<0.000000e+00> : vector<32xf32>
    %35 = vector.multi_reduction <add>, %34, %cst_16 [0] : vector<8x32xf32> to vector<32xf32>
    %36 = vector.shape_cast %35 : vector<32xf32> to vector<1x32xf32>
    %cst_17 = arith.constant 8.000000e+00 : f32
    %37 = vector.broadcast %cst_17 : f32 to vector<1x32xf32>
    %38 = arith.divf %36, %37 : vector<1x32xf32>
    %39 = vector.broadcast %38 : vector<1x32xf32> to vector<8x32xf32>
    %40 = arith.subf %34, %39 : vector<8x32xf32>
    %41 = arith.mulf %40, %40 : vector<8x32xf32>
    %cst_18 = arith.constant dense<0.000000e+00> : vector<32xf32>
    %42 = vector.multi_reduction <add>, %41, %cst_18 [0] : vector<8x32xf32> to vector<32xf32>
    %43 = vector.shape_cast %42 : vector<32xf32> to vector<1x32xf32>
    %cst_19 = arith.constant 8.000000e+00 : f32
    %44 = vector.broadcast %cst_19 : f32 to vector<1x32xf32>
    %45 = arith.divf %43, %44 : vector<1x32xf32>
    %46 = vector.broadcast %38 : vector<1x32xf32> to vector<8x32xf32>
    %47 = arith.subf %34, %46 : vector<8x32xf32>
    %cst_20 = arith.constant 9.99999974E-6 : f32
    %48 = vector.broadcast %cst_20 : f32 to vector<1x32xf32>
    %49 = arith.addf %45, %48 : vector<1x32xf32>
    %50 = math.rsqrt %49 : vector<1x32xf32>
    %51 = vector.broadcast %50 : vector<1x32xf32> to vector<8x32xf32>
    %52 = arith.mulf %47, %51 : vector<8x32xf32>
    %c0_21 = arith.constant 0 : index
    %c0_22 = arith.constant 0 : index
    %53 = vector.load %arg5[%c0_21, %c0_22] : memref<3x32xf32, #tpu.memory_space<vmem>>, vector<1x32xf32>
    %54 = vector.broadcast %53 : vector<1x32xf32> to vector<8x32xf32>
    %55 = arith.mulf %52, %54 : vector<8x32xf32>
    %c1_23 = arith.constant 1 : index
    %c0_24 = arith.constant 0 : index
    %56 = vector.load %arg5[%c1_23, %c0_24] : memref<3x32xf32, #tpu.memory_space<vmem>>, vector<1x32xf32>
    %57 = vector.broadcast %56 : vector<1x32xf32> to vector<8x32xf32>
    %58 = arith.addf %55, %57 : vector<8x32xf32>
    %cst_25 = arith.constant 0.000000e+00 : f32
    %59 = vector.broadcast %cst_25 : f32 to vector<8x32xf32>
    %60 = arith.cmpf oge, %58, %59 : vector<8x32xf32>
    %c2_26 = arith.constant 2 : index
    %c0_27 = arith.constant 0 : index
    %61 = vector.load %arg5[%c2_26, %c0_27] : memref<3x32xf32, #tpu.memory_space<vmem>>, vector<1x32xf32>
    %62 = vector.broadcast %61 : vector<1x32xf32> to vector<8x32xf32>
    %63 = arith.mulf %62, %58 : vector<8x32xf32>
    %64 = arith.select %60, %58, %63 : vector<8x32xi1>, vector<8x32xf32>
    %c0_28 = arith.constant 0 : index
    %c0_29 = arith.constant 0 : index
    %65 = vector.load %arg6[%c0_28, %c0_29] : memref<32x32xf32, #tpu.memory_space<vmem>>, vector<32x32xf32>
    %cst_30 = arith.constant dense<0.000000e+00> : vector<8x32xf32>
    %66 = tpu.matmul %64, %65, %cst_30 {dimension_numbers = #tpu.dot_dimension_numbers<[1], [0], [0], [1], [0, 0, 1, 1], [], []>} : vector<8x32xf32>, vector<32x32xf32>, vector<8x32xf32> -> vector<8x32xf32>
    %cst_31 = arith.constant dense<0.000000e+00> : vector<32xf32>
    %67 = vector.multi_reduction <add>, %66, %cst_31 [0] : vector<8x32xf32> to vector<32xf32>
    %68 = vector.shape_cast %67 : vector<32xf32> to vector<1x32xf32>
    %cst_32 = arith.constant 8.000000e+00 : f32
    %69 = vector.broadcast %cst_32 : f32 to vector<1x32xf32>
    %70 = arith.divf %68, %69 : vector<1x32xf32>
    %71 = vector.broadcast %70 : vector<1x32xf32> to vector<8x32xf32>
    %72 = arith.subf %66, %71 : vector<8x32xf32>
    %73 = arith.mulf %72, %72 : vector<8x32xf32>
    %cst_33 = arith.constant dense<0.000000e+00> : vector<32xf32>
    %74 = vector.multi_reduction <add>, %73, %cst_33 [0] : vector<8x32xf32> to vector<32xf32>
    %75 = vector.shape_cast %74 : vector<32xf32> to vector<1x32xf32>
    %cst_34 = arith.constant 8.000000e+00 : f32
    %76 = vector.broadcast %cst_34 : f32 to vector<1x32xf32>
    %77 = arith.divf %75, %76 : vector<1x32xf32>
    %78 = vector.broadcast %70 : vector<1x32xf32> to vector<8x32xf32>
    %79 = arith.subf %66, %78 : vector<8x32xf32>
    %cst_35 = arith.constant 9.99999974E-6 : f32
    %80 = vector.broadcast %cst_35 : f32 to vector<1x32xf32>
    %81 = arith.addf %77, %80 : vector<1x32xf32>
    %82 = math.rsqrt %81 : vector<1x32xf32>
    %83 = vector.broadcast %82 : vector<1x32xf32> to vector<8x32xf32>
    %84 = arith.mulf %79, %83 : vector<8x32xf32>
    %c0_36 = arith.constant 0 : index
    %c0_37 = arith.constant 0 : index
    %85 = vector.load %arg7[%c0_36, %c0_37] : memref<3x32xf32, #tpu.memory_space<vmem>>, vector<1x32xf32>
    %86 = vector.broadcast %85 : vector<1x32xf32> to vector<8x32xf32>
    %87 = arith.mulf %84, %86 : vector<8x32xf32>
    %c1_38 = arith.constant 1 : index
    %c0_39 = arith.constant 0 : index
    %88 = vector.load %arg7[%c1_38, %c0_39] : memref<3x32xf32, #tpu.memory_space<vmem>>, vector<1x32xf32>
    %89 = vector.broadcast %88 : vector<1x32xf32> to vector<8x32xf32>
    %90 = arith.addf %87, %89 : vector<8x32xf32>
    %cst_40 = arith.constant 0.000000e+00 : f32
    %91 = vector.broadcast %cst_40 : f32 to vector<8x32xf32>
    %92 = arith.cmpf oge, %90, %91 : vector<8x32xf32>
    %c2_41 = arith.constant 2 : index
    %c0_42 = arith.constant 0 : index
    %93 = vector.load %arg7[%c2_41, %c0_42] : memref<3x32xf32, #tpu.memory_space<vmem>>, vector<1x32xf32>
    %94 = vector.broadcast %93 : vector<1x32xf32> to vector<8x32xf32>
    %95 = arith.mulf %94, %90 : vector<8x32xf32>
    %96 = arith.select %92, %90, %95 : vector<8x32xi1>, vector<8x32xf32>
    %c0_43 = arith.constant 0 : index
    %c0_44 = arith.constant 0 : index
    %97 = vector.load %arg8[%c0_43, %c0_44] : memref<32x16xf32, #tpu.memory_space<vmem>>, vector<32x16xf32>
    %cst_45 = arith.constant dense<0.000000e+00> : vector<8x16xf32>
    %98 = tpu.matmul %96, %97, %cst_45 {dimension_numbers = #tpu.dot_dimension_numbers<[1], [0], [0], [1], [0, 0, 1, 1], [], []>} : vector<8x32xf32>, vector<32x16xf32>, vector<8x16xf32> -> vector<8x16xf32>
    %c0_46 = arith.constant 0 : index
    %c0_47 = arith.constant 0 : index
    %99 = vector.load %arg9[%c0_46, %c0_47] : memref<1x16xf32, #tpu.memory_space<vmem>>, vector<1x16xf32>
    %100 = vector.broadcast %99 : vector<1x16xf32> to vector<8x16xf32>
    %101 = arith.addf %98, %100 : vector<8x16xf32>
    %102 = vector.extract_strided_slice %101 {offsets = [0, 0], sizes = [8, 8], strides = [1, 1]} : vector<8x16xf32> to vector<8x8xf32>
    %103 = vector.extract_strided_slice %101 {offsets = [0, 8], sizes = [8, 8], strides = [1, 1]} : vector<8x16xf32> to vector<8x8xf32>
    %c0_48 = arith.constant 0 : index
    %c0_49 = arith.constant 0 : index
    %104 = vector.load %arg19[%c0_48, %c0_49] : memref<8x8xf32, #tpu.memory_space<vmem>>, vector<8x8xf32>
    tpu.vector_store %arg19[%c0_48, %c0_49], %102 {strides = array<i32>} : memref<8x8xf32, #tpu.memory_space<vmem>>, vector<8x8xf32>,
    %c0_50 = arith.constant 0 : index
    %c0_51 = arith.constant 0 : index
    %105 = vector.load %arg20[%c0_50, %c0_51] : memref<8x8xf32, #tpu.memory_space<vmem>>, vector<8x8xf32>
    tpu.vector_store %arg20[%c0_50, %c0_51], %103 {strides = array<i32>} : memref<8x8xf32, #tpu.memory_space<vmem>>, vector<8x8xf32>,
    %c0_52 = arith.constant 0 : index
    %c0_53 = arith.constant 0 : index
    %106 = vector.load %arg1[%c0_52, %c0_53] : memref<8x8xf32, #tpu.memory_space<vmem>>, vector<8x8xf32>
    %cst_54 = arith.constant 5.000000e-01 : f32
    %107 = vector.broadcast %cst_54 : f32 to vector<8x8xf32>
    %108 = arith.mulf %107, %103 : vector<8x8xf32>
    %109 = math.exp %108 : vector<8x8xf32>
    %110 = arith.mulf %106, %109 : vector<8x8xf32>
    %111 = arith.addf %110, %102 : vector<8x8xf32>
    %c0_55 = arith.constant 0 : index
    %c0_56 = arith.constant 0 : index
    %112 = vector.load %arg10[%c0_55, %c0_56] : memref<8x32xf32, #tpu.memory_space<vmem>>, vector<8x32xf32>
    %cst_57 = arith.constant dense<0.000000e+00> : vector<8x32xf32>
    %113 = tpu.matmul %111, %112, %cst_57 {dimension_numbers = #tpu.dot_dimension_numbers<[1], [0], [0], [1], [0, 0, 1, 1], [], []>} : vector<8x8xf32>, vector<8x32xf32>, vector<8x32xf32> -> vector<8x32xf32>
    %cst_58 = arith.constant dense<0.000000e+00> : vector<32xf32>
    %114 = vector.multi_reduction <add>, %113, %cst_58 [0] : vector<8x32xf32> to vector<32xf32>
    %115 = vector.shape_cast %114 : vector<32xf32> to vector<1x32xf32>
    %cst_59 = arith.constant 8.000000e+00 : f32
    %116 = vector.broadcast %cst_59 : f32 to vector<1x32xf32>
    %117 = arith.divf %115, %116 : vector<1x32xf32>
    %118 = vector.broadcast %117 : vector<1x32xf32> to vector<8x32xf32>
    %119 = arith.subf %113, %118 : vector<8x32xf32>
    %120 = arith.mulf %119, %119 : vector<8x32xf32>
    %cst_60 = arith.constant dense<0.000000e+00> : vector<32xf32>
    %121 = vector.multi_reduction <add>, %120, %cst_60 [0] : vector<8x32xf32> to vector<32xf32>
    %122 = vector.shape_cast %121 : vector<32xf32> to vector<1x32xf32>
    %cst_61 = arith.constant 8.000000e+00 : f32
    %123 = vector.broadcast %cst_61 : f32 to vector<1x32xf32>
    %124 = arith.divf %122, %123 : vector<1x32xf32>
    %125 = vector.broadcast %117 : vector<1x32xf32> to vector<8x32xf32>
    %126 = arith.subf %113, %125 : vector<8x32xf32>
    %cst_62 = arith.constant 9.99999974E-6 : f32
    %127 = vector.broadcast %cst_62 : f32 to vector<1x32xf32>
    %128 = arith.addf %124, %127 : vector<1x32xf32>
    %129 = math.rsqrt %128 : vector<1x32xf32>
    %130 = vector.broadcast %129 : vector<1x32xf32> to vector<8x32xf32>
    %131 = arith.mulf %126, %130 : vector<8x32xf32>
    %c0_63 = arith.constant 0 : index
    %c0_64 = arith.constant 0 : index
    %132 = vector.load %arg11[%c0_63, %c0_64] : memref<3x32xf32, #tpu.memory_space<vmem>>, vector<1x32xf32>
    %133 = vector.broadcast %132 : vector<1x32xf32> to vector<8x32xf32>
    %134 = arith.mulf %131, %133 : vector<8x32xf32>
    %c1_65 = arith.constant 1 : index
    %c0_66 = arith.constant 0 : index
    %135 = vector.load %arg11[%c1_65, %c0_66] : memref<3x32xf32, #tpu.memory_space<vmem>>, vector<1x32xf32>
    %136 = vector.broadcast %135 : vector<1x32xf32> to vector<8x32xf32>
    %137 = arith.addf %134, %136 : vector<8x32xf32>
    %cst_67 = arith.constant 0.000000e+00 : f32
    %138 = vector.broadcast %cst_67 : f32 to vector<8x32xf32>
    %139 = arith.cmpf oge, %137, %138 : vector<8x32xf32>
    %c2_68 = arith.constant 2 : index
    %c0_69 = arith.constant 0 : index
    %140 = vector.load %arg11[%c2_68, %c0_69] : memref<3x32xf32, #tpu.memory_space<vmem>>, vector<1x32xf32>
    %141 = vector.broadcast %140 : vector<1x32xf32> to vector<8x32xf32>
    %142 = arith.mulf %141, %137 : vector<8x32xf32>
    %143 = arith.select %139, %137, %142 : vector<8x32xi1>, vector<8x32xf32>
    %c0_70 = arith.constant 0 : index
    %c0_71 = arith.constant 0 : index
    %144 = vector.load %arg12[%c0_70, %c0_71] : memref<32x32xf32, #tpu.memory_space<vmem>>, vector<32x32xf32>
    %cst_72 = arith.constant dense<0.000000e+00> : vector<8x32xf32>
    %145 = tpu.matmul %143, %144, %cst_72 {dimension_numbers = #tpu.dot_dimension_numbers<[1], [0], [0], [1], [0, 0, 1, 1], [], []>} : vector<8x32xf32>, vector<32x32xf32>, vector<8x32xf32> -> vector<8x32xf32>
    %cst_73 = arith.constant dense<0.000000e+00> : vector<32xf32>
    %146 = vector.multi_reduction <add>, %145, %cst_73 [0] : vector<8x32xf32> to vector<32xf32>
    %147 = vector.shape_cast %146 : vector<32xf32> to vector<1x32xf32>
    %cst_74 = arith.constant 8.000000e+00 : f32
    %148 = vector.broadcast %cst_74 : f32 to vector<1x32xf32>
    %149 = arith.divf %147, %148 : vector<1x32xf32>
    %150 = vector.broadcast %149 : vector<1x32xf32> to vector<8x32xf32>
    %151 = arith.subf %145, %150 : vector<8x32xf32>
    %152 = arith.mulf %151, %151 : vector<8x32xf32>
    %cst_75 = arith.constant dense<0.000000e+00> : vector<32xf32>
    %153 = vector.multi_reduction <add>, %152, %cst_75 [0] : vector<8x32xf32> to vector<32xf32>
    %154 = vector.shape_cast %153 : vector<32xf32> to vector<1x32xf32>
    %cst_76 = arith.constant 8.000000e+00 : f32
    %155 = vector.broadcast %cst_76 : f32 to vector<1x32xf32>
    %156 = arith.divf %154, %155 : vector<1x32xf32>
    %157 = vector.broadcast %149 : vector<1x32xf32> to vector<8x32xf32>
    %158 = arith.subf %145, %157 : vector<8x32xf32>
    %cst_77 = arith.constant 9.99999974E-6 : f32
    %159 = vector.broadcast %cst_77 : f32 to vector<1x32xf32>
    %160 = arith.addf %156, %159 : vector<1x32xf32>
    %161 = math.rsqrt %160 : vector<1x32xf32>
    %162 = vector.broadcast %161 : vector<1x32xf32> to vector<8x32xf32>
    %163 = arith.mulf %158, %162 : vector<8x32xf32>
    %c0_78 = arith.constant 0 : index
    %c0_79 = arith.constant 0 : index
    %164 = vector.load %arg13[%c0_78, %c0_79] : memref<3x32xf32, #tpu.memory_space<vmem>>, vector<1x32xf32>
    %165 = vector.broadcast %164 : vector<1x32xf32> to vector<8x32xf32>
    %166 = arith.mulf %163, %165 : vector<8x32xf32>
    %c1_80 = arith.constant 1 : index
    %c0_81 = arith.constant 0 : index
    %167 = vector.load %arg13[%c1_80, %c0_81] : memref<3x32xf32, #tpu.memory_space<vmem>>, vector<1x32xf32>
    %168 = vector.broadcast %167 : vector<1x32xf32> to vector<8x32xf32>
    %169 = arith.addf %166, %168 : vector<8x32xf32>
    %cst_82 = arith.constant 0.000000e+00 : f32
    %170 = vector.broadcast %cst_82 : f32 to vector<8x32xf32>
    %171 = arith.cmpf oge, %169, %170 : vector<8x32xf32>
    %c2_83 = arith.constant 2 : index
    %c0_84 = arith.constant 0 : index
    %172 = vector.load %arg13[%c2_83, %c0_84] : memref<3x32xf32, #tpu.memory_space<vmem>>, vector<1x32xf32>
    %173 = vector.broadcast %172 : vector<1x32xf32> to vector<8x32xf32>
    %174 = arith.mulf %173, %169 : vector<8x32xf32>
    %175 = arith.select %171, %169, %174 : vector<8x32xi1>, vector<8x32xf32>
    %c0_85 = arith.constant 0 : index
    %c0_86 = arith.constant 0 : index
    %176 = vector.load %arg14[%c0_85, %c0_86] : memref<32x32xf32, #tpu.memory_space<vmem>>, vector<32x32xf32>
    %cst_87 = arith.constant dense<0.000000e+00> : vector<8x32xf32>
    %177 = tpu.matmul %175, %176, %cst_87 {dimension_numbers = #tpu.dot_dimension_numbers<[1], [0], [0], [1], [0, 0, 1, 1], [], []>} : vector<8x32xf32>, vector<32x32xf32>, vector<8x32xf32> -> vector<8x32xf32>
    %cst_88 = arith.constant dense<0.000000e+00> : vector<32xf32>
    %178 = vector.multi_reduction <add>, %177, %cst_88 [0] : vector<8x32xf32> to vector<32xf32>
    %179 = vector.shape_cast %178 : vector<32xf32> to vector<1x32xf32>
    %cst_89 = arith.constant 8.000000e+00 : f32
    %180 = vector.broadcast %cst_89 : f32 to vector<1x32xf32>
    %181 = arith.divf %179, %180 : vector<1x32xf32>
    %182 = vector.broadcast %181 : vector<1x32xf32> to vector<8x32xf32>
    %183 = arith.subf %177, %182 : vector<8x32xf32>
    %184 = arith.mulf %183, %183 : vector<8x32xf32>
    %cst_90 = arith.constant dense<0.000000e+00> : vector<32xf32>
    %185 = vector.multi_reduction <add>, %184, %cst_90 [0] : vector<8x32xf32> to vector<32xf32>
    %186 = vector.shape_cast %185 : vector<32xf32> to vector<1x32xf32>
    %cst_91 = arith.constant 8.000000e+00 : f32
    %187 = vector.broadcast %cst_91 : f32 to vector<1x32xf32>
    %188 = arith.divf %186, %187 : vector<1x32xf32>
    %189 = vector.broadcast %181 : vector<1x32xf32> to vector<8x32xf32>
    %190 = arith.subf %177, %189 : vector<8x32xf32>
    %cst_92 = arith.constant 9.99999974E-6 : f32
    %191 = vector.broadcast %cst_92 : f32 to vector<1x32xf32>
    %192 = arith.addf %188, %191 : vector<1x32xf32>
    %193 = math.rsqrt %192 : vector<1x32xf32>
    %194 = vector.broadcast %193 : vector<1x32xf32> to vector<8x32xf32>
    %195 = arith.mulf %190, %194 : vector<8x32xf32>
    %c0_93 = arith.constant 0 : index
    %c0_94 = arith.constant 0 : index
    %196 = vector.load %arg15[%c0_93, %c0_94] : memref<3x32xf32, #tpu.memory_space<vmem>>, vector<1x32xf32>
    %197 = vector.broadcast %196 : vector<1x32xf32> to vector<8x32xf32>
    %198 = arith.mulf %195, %197 : vector<8x32xf32>
    %c1_95 = arith.constant 1 : index
    %c0_96 = arith.constant 0 : index
    %199 = vector.load %arg15[%c1_95, %c0_96] : memref<3x32xf32, #tpu.memory_space<vmem>>, vector<1x32xf32>
    %200 = vector.broadcast %199 : vector<1x32xf32> to vector<8x32xf32>
    %201 = arith.addf %198, %200 : vector<8x32xf32>
    %cst_97 = arith.constant 0.000000e+00 : f32
    %202 = vector.broadcast %cst_97 : f32 to vector<8x32xf32>
    %203 = arith.cmpf oge, %201, %202 : vector<8x32xf32>
    %c2_98 = arith.constant 2 : index
    %c0_99 = arith.constant 0 : index
    %204 = vector.load %arg15[%c2_98, %c0_99] : memref<3x32xf32, #tpu.memory_space<vmem>>, vector<1x32xf32>
    %205 = vector.broadcast %204 : vector<1x32xf32> to vector<8x32xf32>
    %206 = arith.mulf %205, %201 : vector<8x32xf32>
    %207 = arith.select %203, %201, %206 : vector<8x32xi1>, vector<8x32xf32>
    %c0_100 = arith.constant 0 : index
    %c0_101 = arith.constant 0 : index
    %208 = vector.load %arg16[%c0_100, %c0_101] : memref<32x12xf32, #tpu.memory_space<vmem>>, vector<32x12xf32>
    %cst_102 = arith.constant dense<0.000000e+00> : vector<8x12xf32>
    %209 = tpu.matmul %207, %208, %cst_102 {dimension_numbers = #tpu.dot_dimension_numbers<[1], [0], [0], [1], [0, 0, 1, 1], [], []>} : vector<8x32xf32>, vector<32x12xf32>, vector<8x12xf32> -> vector<8x12xf32>
    %c0_103 = arith.constant 0 : index
    %c0_104 = arith.constant 0 : index
    %210 = vector.load %arg17[%c0_103, %c0_104] : memref<1x12xf32, #tpu.memory_space<vmem>>, vector<1x12xf32>
    %211 = vector.broadcast %210 : vector<1x12xf32> to vector<8x12xf32>
    %212 = arith.addf %209, %211 : vector<8x12xf32>
    %213 = vector.extract_strided_slice %212 {offsets = [0, 0], sizes = [8, 4], strides = [1, 1]} : vector<8x12xf32> to vector<8x4xf32>
    %c0_105 = arith.constant 0 : index
    %c0_106 = arith.constant 0 : index
    %214 = vector.load %arg18[%c0_105, %c0_106] : memref<8x12xf32, #tpu.memory_space<vmem>>, vector<8x4xf32>
    tpu.vector_store %arg18[%c0_105, %c0_106], %213 {strides = array<i32>} : memref<8x12xf32, #tpu.memory_space<vmem>>, vector<8x4xf32>,
    %215 = vector.extract_strided_slice %212 {offsets = [0, 4], sizes = [8, 3], strides = [1, 1]} : vector<8x12xf32> to vector<8x3xf32>
    %cst_107 = arith.constant dense<0xFF800000> : vector<8xf32>
    %216 = vector.multi_reduction <maximumf>, %215, %cst_107 [1] : vector<8x3xf32> to vector<8xf32>
    %217 = vector.shape_cast %216 : vector<8xf32> to vector<8x1xf32>
    %218 = vector.broadcast %217 : vector<8x1xf32> to vector<8x3xf32>
    %219 = arith.subf %215, %218 : vector<8x3xf32>
    %220 = math.exp %219 : vector<8x3xf32>
    %cst_108 = arith.constant dense<0.000000e+00> : vector<8xf32>
    %221 = vector.multi_reduction <add>, %220, %cst_108 [1] : vector<8x3xf32> to vector<8xf32>
    %222 = vector.shape_cast %221 : vector<8xf32> to vector<8x1xf32>
    %223 = math.log %222 : vector<8x1xf32>
    %224 = vector.broadcast %223 : vector<8x1xf32> to vector<8x3xf32>
    %225 = arith.subf %219, %224 : vector<8x3xf32>
    %c0_109 = arith.constant 0 : index
    %c4 = arith.constant 4 : index
    %226 = vector.load %arg18[%c0_109, %c4] : memref<8x12xf32, #tpu.memory_space<vmem>>, vector<8x3xf32>
    tpu.vector_store %arg18[%c0_109, %c4], %225 {strides = array<i32>} : memref<8x12xf32, #tpu.memory_space<vmem>>, vector<8x3xf32>,
    %227 = vector.extract_strided_slice %212 {offsets = [0, 7], sizes = [8, 5], strides = [1, 1]} : vector<8x12xf32> to vector<8x5xf32>
    %cst_110 = arith.constant dense<0xFF800000> : vector<8xf32>
    %228 = vector.multi_reduction <maximumf>, %227, %cst_110 [1] : vector<8x5xf32> to vector<8xf32>
    %229 = vector.shape_cast %228 : vector<8xf32> to vector<8x1xf32>
    %230 = vector.broadcast %229 : vector<8x1xf32> to vector<8x5xf32>
    %231 = arith.subf %227, %230 : vector<8x5xf32>
    %232 = math.exp %231 : vector<8x5xf32>
    %cst_111 = arith.constant dense<0.000000e+00> : vector<8xf32>
    %233 = vector.multi_reduction <add>, %232, %cst_111 [1] : vector<8x5xf32> to vector<8xf32>
    %234 = vector.shape_cast %233 : vector<8xf32> to vector<8x1xf32>
    %235 = math.log %234 : vector<8x1xf32>
    %236 = vector.broadcast %235 : vector<8x1xf32> to vector<8x5xf32>
    %237 = arith.subf %231, %236 : vector<8x5xf32>
    %c0_112 = arith.constant 0 : index
    %c7 = arith.constant 7 : index
    %238 = vector.load %arg18[%c0_112, %c7] : memref<8x12xf32, #tpu.memory_space<vmem>>, vector<8x5xf32>
    tpu.vector_store %arg18[%c0_112, %c7], %237 {strides = array<i32>} : memref<8x12xf32, #tpu.memory_space<vmem>>, vector<8x5xf32>,
    return
  }
}

</mosaic_0001>

<bundles_post_ra>
// kernel: tpu_custom_call.1
= control target key start
LH: loop header
LB: loop body
LE: loop exit
PB: predicated region body
PF: predicated region fallthrough
CT: control target
= control target key end

     0   :  { %s2138_s0 = inlined_call_operand.hbm [shape: f32[8,11], index: 0, kind: input, shape index: {}]   ;;  %s2139_s1 = inlined_call_operand.hbm [shape: f32[8,8], index: 1, kind: input, shape index: {}]   ;;  %s2140_s2 = inlined_call_operand.hbm [shape: f32[11,32], index: 2, kind: input, shape index: {}]   ;;  %s2141_s3 = inlined_call_operand.hbm [shape: f32[3,32], index: 3, kind: input, shape index: {}]   ;;  %s2142_s4 = inlined_call_operand.vmem [shape: f32[32,32], index: 4, kind: input, shape index: {}]   ;;  %s2143_s5 = inlined_call_operand.hbm [shape: f32[3,32], index: 5, kind: input, shape index: {}]   ;;  %s2144_s6 = inlined_call_operand.vmem [shape: f32[32,32], index: 6, kind: input, shape index: {}]   ;;  %s2145_s7 = inlined_call_operand.hbm [shape: f32[3,32], index: 7, kind: input, shape index: {}]   ;;  %s2146_s8 = inlined_call_operand.vmem [shape: f32[32,16], index: 8, kind: input, shape index: {}]   ;;  %s2147_s9 = inlined_call_operand.hbm [shape: f32[1,16], index: 9, kind: input, shape index: {}]   ;;  %s2148_s10 = inlined_call_operand.hbm [shape: f32[8,32], index: 10, kind: input, shape index: {}]   ;;  %s2149_s11 = inlined_call_operand.hbm [shape: f32[3,32], index: 11, kind: input, shape index: {}]   ;;  %s2150_s12 = inlined_call_operand.vmem [shape: f32[32,32], index: 12, kind: input, shape index: {}]   ;;  %s2151_s13 = inlined_call_operand.hbm [shape: f32[3,32], index: 13, kind: input, shape index: {}]   ;;  %s2152_s14 = inlined_call_operand.vmem [shape: f32[32,32], index: 14, kind: input, shape index: {}]   ;;  %s2153_s15 = inlined_call_operand.vmem [shape: f32[3,32], index: 15, kind: input, shape index: {}]   ;;  %s2154_s16 = inlined_call_operand.vmem [shape: f32[32,12], index: 16, kind: input, shape index: {}]   ;;  %s2155_s17 = inlined_call_operand.vmem [shape: f32[1,12], index: 17, kind: input, shape index: {}]   ;;  %s2156_s18 = inlined_call_operand.hbm [shape: f32[8,12], index: 18, kind: output, shape index: {0}]   ;;  %s2157_s19 = inlined_call_operand.hbm [shape: f32[8,8], index: 19, kind: output, shape index: {1}]   ;;  %s2158_s20 = inlined_call_operand.hbm [shape: f32[8,8], index: 20, kind: output, shape index: {2}]  }
   0x1   :  { %2164 = sst [smem:[#allocation31_spill]] %s2138_s0 }
   0x2   :  { %2165 = sst [smem:[#allocation32_spill]] %s2139_s1 }
   0x3   :  { %2166 = sst [smem:[#allocation33_spill]] %s2140_s2 }
   0x4   :  { %2167 = sst [smem:[#allocation34_spill]] %s2141_s3 }
   0x5   :  { %2168 = sst [smem:[#allocation35_spill]] %s2142_s4 }
   0x6   :  { %26 = vsyncpa [#allocation3], 0 }
   0x7   :  { %27 = vsyncpa [#allocation6], 0 }
   0x8   :  { %28 = vsyncpa [#allocation9], 0 }
   0x9   :  { %29 = vsyncpa [#allocation12], 0 }
   0xa   :  { %30 = vsyncpa [#allocation15], 0 }
   0xb   :  { %31 = vsyncpa [#allocation18], 0 }
   0xc   :  { %32 = vsyncpa [#allocation4], 0 }
   0xd   :  { %33 = vsyncpa [#allocation21], 0  ;;  %s1693_s1 = smov [#allocation5]   ;;  %s1694_s23 = smov [#allocation8]  }
   0xe   :  { %s50_s22 = sshll.u32 %s1693_s1, 4  ;;  %s72_s24 = sshll.u32 %s1694_s23, 4  ;;  %s51_s22 = int_to_ptr.vmem [resolvable:$true] %s50_s22  ;;  %s73_s24 = int_to_ptr.vmem [resolvable:$true] %s72_s24 }
   0xf   :  { %s2169_s3 = sld [smem:[#allocation32_spill]] }
  0x15   :  { %s1391_s26 = scalar_lea.hbm %s2169_s3, 128 }
  0x16   :  { %p1392_p0 = scmp.ne.s32.totalorder %s2169_s3, %s1391_s26  ;;  %p1395_p1 = scmp.lt.u32.totalorder %s1391_s26, %s2169_s3 }
  0x18   :  { %p1397_p2 = pnand %p1395_p1, %p1392_p0 }
  0x1a   :  { %1400 = shalt.err (!%p1397_p2)
}
  0x1b   :  { %s1401_s30 = scalar_lea.vmem %s51_s22, 128  ;;  %p1406_p4 = scmp.lt.s32.totalorder %s51_s22, %s51_s22 }
  0x1c   :  { %p1402_p3 = scmp.ne.s32.totalorder %s51_s22, %s1401_s30  ;;  %p1407_p5 = scmp.lt.s32.totalorder %s1401_s30, %s1401_s30 }
  0x1e   :  { %p1408_p6 = por %p1407_p5, %p1406_p4 }
  0x20   :  { %p1409_p7 = pnand %p1408_p6, %p1402_p3 }
  0x22   :  { %1412 = shalt.err (!%p1409_p7)
}
  0x23   :  { %53 = dma.hbm_to_vmem [thread:$0]  %s2169_s3, 128, %s51_s22, [#allocation6]  }
  0x24   :  { %s2170_s2 = sld [smem:[#allocation34_spill]] }
  0x2a   :  { %s1413_s25 = scalar_lea.hbm %s2170_s2, 64 }
  0x2b   :  { %p1414_p8 = scmp.ne.s32.totalorder %s2170_s2, %s1413_s25  ;;  %p1417_p9 = scmp.lt.u32.totalorder %s1413_s25, %s2170_s2 }
  0x2d   :  { %p1419_p10 = pnand %p1417_p9, %p1414_p8 }
  0x2f   :  { %1422 = shalt.err (!%p1419_p10)
}
  0x30   :  { %s1423_s29 = scalar_lea.vmem %s73_s24, 64  ;;  %p1428_p12 = scmp.lt.s32.totalorder %s73_s24, %s73_s24 }
  0x31   :  { %p1424_p11 = scmp.ne.s32.totalorder %s73_s24, %s1423_s29  ;;  %p1429_p13 = scmp.lt.s32.totalorder %s1423_s29, %s1423_s29 }
  0x33   :  { %p1430_p0 = por %p1429_p13, %p1428_p12 }
  0x35   :  { %p1431_p1 = pnand %p1430_p0, %p1424_p11 }
  0x37   :  { %1434 = shalt.err (!%p1431_p1)
}
  0x38   :  { %75 = dma.hbm_to_vmem [thread:$0]  %s2170_s2, 64, %s73_s24, [#allocation9]  }
  0x39   :  { %s1695_s30 = smov [#allocation11]   ;;  %s1696_s21 = smov [#allocation14]  }
  0x3a   :  { %s96_s0 = sshll.u32 %s1695_s30, 4  ;;  %s118_s1 = sshll.u32 %s1696_s21, 4  ;;  %s97_s0 = int_to_ptr.vmem [resolvable:$true] %s96_s0  ;;  %s119_s1 = int_to_ptr.vmem [resolvable:$true] %s118_s1 }
  0x3b   :  { %s1435_s27 = scalar_lea.hbm %s2145_s7, 64 }
  0x3c   :  { %p1436_p2 = scmp.ne.s32.totalorder %s2145_s7, %s1435_s27  ;;  %p1439_p3 = scmp.lt.u32.totalorder %s1435_s27, %s2145_s7 }
  0x3e   :  { %p1441_p4 = pnand %p1439_p3, %p1436_p2 }
  0x40   :  { %1444 = shalt.err (!%p1441_p4)
}
  0x41   :  { %s1445_s24 = scalar_lea.vmem %s97_s0, 64  ;;  %p1450_p6 = scmp.lt.s32.totalorder %s97_s0, %s97_s0 }
  0x42   :  { %p1446_p5 = scmp.ne.s32.totalorder %s97_s0, %s1445_s24  ;;  %p1451_p7 = scmp.lt.s32.totalorder %s1445_s24, %s1445_s24 }
  0x44   :  { %p1452_p8 = por %p1451_p7, %p1450_p6 }
  0x46   :  { %p1453_p9 = pnand %p1452_p8, %p1446_p5 }
  0x48   :  { %1456 = shalt.err (!%p1453_p9)
}
  0x49   :  { %99 = dma.hbm_to_vmem [thread:$0]  %s2145_s7, 64, %s97_s0, [#allocation12]  }
  0x4a   :  { %s1457_s21 = scalar_lea.hbm %s2148_s10, 128 }
  0x4b   :  { %p1458_p10 = scmp.ne.s32.totalorder %s2148_s10, %s1457_s21  ;;  %p1461_p11 = scmp.lt.u32.totalorder %s1457_s21, %s2148_s10 }
  0x4d   :  { %p1463_p12 = pnand %p1461_p11, %p1458_p10 }
  0x4f   :  { %1466 = shalt.err (!%p1463_p12)
}
  0x50   :  { %s1467_s26 = scalar_lea.vmem %s119_s1, 128  ;;  %p1472_p0 = scmp.lt.s32.totalorder %s119_s1, %s119_s1 }
  0x51   :  { %p1468_p13 = scmp.ne.s32.totalorder %s119_s1, %s1467_s26  ;;  %p1473_p1 = scmp.lt.s32.totalorder %s1467_s26, %s1467_s26 }
  0x53   :  { %p1474_p2 = por %p1473_p1, %p1472_p0 }
  0x55   :  { %p1475_p3 = pnand %p1474_p2, %p1468_p13 }
  0x57   :  { %1478 = shalt.err (!%p1475_p3)
}
  0x58   :  { %121 = dma.hbm_to_vmem [thread:$0]  %s2148_s10, 128, %s119_s1, [#allocation15]  }
  0x59   :  { %s1697_s4 = smov [#allocation2]   ;;  %s1698_s24 = smov [#allocation7]  }
  0x5a   :  { %s40_s29 = sshll.u32 %s1697_s4, 4  ;;  %s59_s2 = sshll.u32 %s1698_s24, 4  ;;  %s41_s29 = int_to_ptr.vmem [resolvable:$true] %s40_s29  ;;  %s1868_s2 = int_to_ptr.vmem [resolvable:$true] %s59_s2 }
  0x5b   :  { %s2171_s30 = sld [smem:[#allocation31_spill]] }
  0x61   :  { %s1479_s21 = scalar_lea.hbm %s2171_s30, 128 }
  0x62   :  { %p1480_p4 = scmp.ne.s32.totalorder %s2171_s30, %s1479_s21  ;;  %p1483_p5 = scmp.lt.u32.totalorder %s1479_s21, %s2171_s30 }
  0x64   :  { %p1485_p6 = pnand %p1483_p5, %p1480_p4 }
  0x66   :  { %1488 = shalt.err (!%p1485_p6)
}
  0x67   :  { %s1489_s10 = scalar_lea.vmem %s41_s29, 128  ;;  %p1494_p8 = scmp.lt.s32.totalorder %s41_s29, %s41_s29 }
  0x68   :  { %p1490_p7 = scmp.ne.s32.totalorder %s41_s29, %s1489_s10  ;;  %p1495_p9 = scmp.lt.s32.totalorder %s1489_s10, %s1489_s10 }
  0x6a   :  { %p1496_p10 = por %p1495_p9, %p1494_p8 }
  0x6c   :  { %p1497_p11 = pnand %p1496_p10, %p1490_p7 }
  0x6e   :  { %1500 = shalt.err (!%p1497_p11)
}
  0x6f   :  { %43 = dma.hbm_to_vmem [thread:$0]  %s2171_s30, 128, %s41_s29, [#allocation3]  }
  0x70   :  { %s2172_s4 = sld [smem:[#allocation33_spill]] }
  0x76   :  { %s1501_s24 = scalar_lea.hbm %s2172_s4, 256 }
  0x77   :  { %p1502_p12 = scmp.ne.s32.totalorder %s2172_s4, %s1501_s24  ;;  %p1505_p13 = scmp.lt.u32.totalorder %s1501_s24, %s2172_s4 }
  0x79   :  { %p1507_p0 = pnand %p1505_p13, %p1502_p12 }
  0x7b   :  { %1510 = shalt.err (!%p1507_p0)
}
  0x7c   :  { %s1511_s25 = scalar_lea.vmem %s1868_s2, 256  ;;  %p1516_p2 = scmp.lt.s32.totalorder %s1868_s2, %s1868_s2 }
  0x7d   :  { %p1512_p1 = scmp.ne.s32.totalorder %s1868_s2, %s1511_s25  ;;  %p1517_p3 = scmp.lt.s32.totalorder %s1511_s25, %s1511_s25 }
  0x7f   :  { %p1518_p4 = por %p1517_p3, %p1516_p2 }
  0x81   :  { %p1519_p5 = pnand %p1518_p4, %p1512_p1 }
  0x83   :  { %1522 = shalt.err (!%p1519_p5)
}
  0x84   :  { %s1699_s29 = smov 128   ;;  %s1700_s30 = smov 8  }
  0x85   :  { %65 = dma.hbm_to_vmem [thread:$0]  %s2172_s4, 256, %s1868_s2, [#allocation6], %s1699_s29, %s1699_s29, %s1700_s30  }
  0x86   :  { %s1701_s10 = smov [#allocation10]   ;;  %s1702_s26 = smov [#allocation13]  }
  0x87   :  { %s84_s1 = sshll.u32 %s1701_s10, 4  ;;  %s108_s7 = sshll.u32 %s1702_s26, 4  ;;  %s85_s1 = int_to_ptr.vmem [resolvable:$true] %s84_s1  ;;  %s109_s7 = int_to_ptr.vmem [resolvable:$true] %s108_s7 }
  0x88   :  { %s1523_s22 = scalar_lea.hbm %s2143_s5, 64 }
  0x89   :  { %p1524_p6 = scmp.ne.s32.totalorder %s2143_s5, %s1523_s22  ;;  %p1527_p7 = scmp.lt.u32.totalorder %s1523_s22, %s2143_s5 }
  0x8b   :  { %p1529_p8 = pnand %p1527_p7, %p1524_p6 }
  0x8d   :  { %1532 = shalt.err (!%p1529_p8)
}
  0x8e   :  { %s1533_s2 = scalar_lea.vmem %s85_s1, 64  ;;  %p1538_p10 = scmp.lt.s32.totalorder %s85_s1, %s85_s1 }
  0x8f   :  { %p1534_p9 = scmp.ne.s32.totalorder %s85_s1, %s1533_s2  ;;  %p1539_p11 = scmp.lt.s32.totalorder %s1533_s2, %s1533_s2 }
  0x91   :  { %p1540_p12 = por %p1539_p11, %p1538_p10 }
  0x93   :  { %p1541_p13 = pnand %p1540_p12, %p1534_p9 }
  0x95   :  { %1544 = shalt.err (!%p1541_p13)
}
  0x96   :  { %87 = dma.hbm_to_vmem [thread:$0]  %s2143_s5, 64, %s85_s1, [#allocation9]  }
  0x97   :  { %s1545_s28 = scalar_lea.hbm %s2147_s9, 16 }
  0x98   :  { %p1546_p0 = scmp.ne.s32.totalorder %s2147_s9, %s1545_s28  ;;  %p1549_p1 = scmp.lt.u32.totalorder %s1545_s28, %s2147_s9 }
  0x9a   :  { %p1551_p2 = pnand %p1549_p1, %p1546_p0 }
  0x9c   :  { %1554 = shalt.err (!%p1551_p2)
}
  0x9d   :  { %s1555_s22 = scalar_lea.vmem %s109_s7, 16  ;;  %s1559_s3 = scalar_lea.vmem %s109_s7, 32 }
  0x9e   :  { %p1556_p3 = scmp.ne.s32.totalorder %s109_s7, %s1555_s22  ;;  %p1560_p4 = scmp.lt.s32.totalorder %s109_s7, %s109_s7 }
  0x9f   :  { %p1561_p5 = scmp.lt.s32.totalorder %s1559_s3, %s1555_s22 }
  0xa1   :  { %p1562_p6 = por %p1561_p5, %p1560_p4 }
  0xa3   :  { %p1563_p7 = pnand %p1562_p6, %p1556_p3 }
  0xa5   :  { %1566 = shalt.err (!%p1563_p7)
}
  0xa6   :  { %111 = dma.hbm_to_vmem [thread:$0]  %s2147_s9, 16, %s109_s7, [#allocation12]  }
  0xa7   :  { %s1703_s21 = smov [#allocation16]   ;;  %s1704_s25 = smov [#allocation17]  }
  0xa8   :  { %s128_s23 = sshll.u32 %s1703_s21, 4  ;;  %s140_s2 = sshll.u32 %s1704_s25, 4  ;;  %s129_s23 = int_to_ptr.vmem [resolvable:$true] %s128_s23  ;;  %s141_s2 = int_to_ptr.vmem [resolvable:$true] %s140_s2 }
  0xa9   :  { %s1567_s30 = scalar_lea.hbm %s2149_s11, 64 }
  0xaa   :  { %p1568_p8 = scmp.ne.s32.totalorder %s2149_s11, %s1567_s30  ;;  %p1571_p9 = scmp.lt.u32.totalorder %s1567_s30, %s2149_s11 }
  0xac   :  { %p1573_p10 = pnand %p1571_p9, %p1568_p8 }
  0xae   :  { %1576 = shalt.err (!%p1573_p10)
}
  0xaf   :  { %s1577_s9 = scalar_lea.vmem %s129_s23, 64  ;;  %p1582_p12 = scmp.lt.s32.totalorder %s129_s23, %s129_s23 }
  0xb0   :  { %p1578_p11 = scmp.ne.s32.totalorder %s129_s23, %s1577_s9  ;;  %p1583_p13 = scmp.lt.s32.totalorder %s1577_s9, %s1577_s9 }
  0xb2   :  { %p1584_p0 = por %p1583_p13, %p1582_p12 }
  0xb4   :  { %p1585_p1 = pnand %p1584_p0, %p1578_p11 }
  0xb6   :  { %1588 = shalt.err (!%p1585_p1)
}
  0xb7   :  { %131 = dma.hbm_to_vmem [thread:$0]  %s2149_s11, 64, %s129_s23, [#allocation15]  }
  0xb8   :  { %s1589_s3 = scalar_lea.hbm %s2151_s13, 64 }
  0xb9   :  { %p1590_p2 = scmp.ne.s32.totalorder %s2151_s13, %s1589_s3  ;;  %p1593_p3 = scmp.lt.u32.totalorder %s1589_s3, %s2151_s13 }
  0xbb   :  { %p1595_p4 = pnand %p1593_p3, %p1590_p2 }
  0xbd   :  { %1598 = shalt.err (!%p1595_p4)
}
  0xbe   :  { %s1599_s4 = scalar_lea.vmem %s141_s2, 64  ;;  %p1604_p6 = scmp.lt.s32.totalorder %s141_s2, %s141_s2 }
  0xbf   :  { %p1600_p5 = scmp.ne.s32.totalorder %s141_s2, %s1599_s4  ;;  %p1605_p7 = scmp.lt.s32.totalorder %s1599_s4, %s1599_s4 }
  0xc1   :  { %p1606_p8 = por %p1605_p7, %p1604_p6 }
  0xc3   :  { %p1607_p9 = pnand %p1606_p8, %p1600_p5 }
  0xc5   :  { %1610 = shalt.err (!%p1607_p9)
}
  0xc6   :  { %143 = dma.hbm_to_vmem [thread:$0]  %s2151_s13, 64, %s141_s2, [#allocation18]  }
  0xc7   :  { %1677 = dma.done.wait [#allocation3], 128  }
  0xc8   :  { %1678 = vsyncadd [#allocation3], 4294967168 }
  0xc9   :  { %1679 = dma.done.wait [#allocation6], 384  }
  0xca   :  { %1680 = vsyncadd [#allocation6], 4294966912 }
  0xcb   :  { %1681 = dma.done.wait [#allocation9], 128  }
  0xcc   :  { %1682 = vsyncadd [#allocation9], 4294967168 }
  0xcd   :  { %1683 = dma.done.wait [#allocation12], 80  }
  0xce   :  { %1684 = vsyncadd [#allocation12], 4294967216 }
  0xcf   :  { %1685 = dma.done.wait [#allocation15], 192  }
  0xd0   :  { %1686 = vsyncadd [#allocation15], 4294967104 }
  0xd1   :  { %1687 = dma.done.wait [#allocation18], 64  }
  0xd2   :  { %1688 = vsyncadd [#allocation18], 4294967232  ;;  %v1705_v0 = vmov 0.0|0.0   ;;  %vm1706_vm0 = vmmov 0   ;;  %v1707_v1 = vmov 0.0   ;;  %vm189_vm1 = vcmask 1042432  }
  0xd3   :  { %1307 = vmatprep.subr.bf16.mxu1 %v1705_v0  ;;  %1317 = vmatprep.subr.bf16.mxu0 %v1705_v0  ;;  %v183_v2 = vld [vmem:[#allocation7] sm:$0xff]  ;;  %v184_v3 = vld [vmem:[#allocation7 + $0x8] sm:$0x7]  ;;  %vm1708_vm2 = vmmov 1   ;;  %v182_v5 = vld [vmem:[#allocation2] sm:$0xff]  ;;  %vm185_vm4 = vcmask 89088  }
  0xd4   :  { %1233 = vmatprep.mubr.msk.f32.mxu1 %vm1706_vm0, %v1707_v1  ;;  %1255 = vmatprep.mubr.msk.f32.mxu0 %vm1706_vm0, %v1707_v1  ;;  %vm1309_vm3 = vmpackc.low %vm189_vm1, %vm1708_vm2  ;;  %v1308_v4 = vpack.c.bf16 %v184_v3, %v183_v2  ;;  %s2173_s29 = sld [smem:[#allocation35_spill]]  ;;  %vm263_vm5 = vcmask 261120   ;;  %v1167_v34 = vld [vmem:[#allocation8] ss:$0 sm:$0xff]  ;;  %v1168_v36 = vld [vmem:[#allocation8 + $0x1] ss:$0 sm:$0xff] }
  0xd5   :  { %v1169_v38 = vld [vmem:[#allocation8 + $0x2] ss:$0 sm:$0xff]  ;;  %v425_v43 = vld [vmem:[%s2144_s6 + $0x8] sm:$0xff]  ;;  %v426_v45 = vld [vmem:[%s2144_s6 + $0x10] sm:$0xff]  ;;  %vm626_vm9 = vcmask 64512   ;;  %vm1099_vm13 = vcmask 97336  }
  0xd6   :  { %1310 = vmatpush3.bf16.msk.msra.mxu1 %vm1309_vm3, %v1308_v4  ;;  %v424_v42 = vld [vmem:[%s2144_s6] sm:$0xff]  ;;  %v427_v46 = vld [vmem:[%s2144_s6 + $0x18] sm:$0xff]  ;;  %vm1080_vm14 = vcmask 56352   ;;  %vm1078_vm15 = vcmask 31744   ;;  %vm1110_vm1 = vcmask 39936   ;;  %s1712_s0 = smov [#allocation20]  }
  0xd7   :  { %1311 = vmatprep.subr.bf16.mxu1 %v1705_v0  ;;  %v1318_v44 = vpack.c.bf16 %v425_v43, %v424_v42  ;;  %v1321_v47 = vpack.c.bf16 %v427_v46, %v426_v45  ;;  %v1176_v46 = vld [vmem:[#allocation11 + $0x1] ss:$0 sm:$0xff] }
  0xd9   :  { %1234 = vmatmul.mubr.msk.f32.vlgmr.msra.gmra.mrb[0].mxu1 %vm185_vm4, %v182_v5  ;;  %1319 = vmatpush3.bf16.msra.mxu0 %v1318_v44  ;;  %v1175_v44 = vld [vmem:[#allocation11] ss:$0 sm:$0xff] }
  0xda   :  { %1244 = vmatprep.mubr.msk.f32.mxu1 %vm1706_vm0, %v1707_v1  ;;  %v306_v6 = vld [vmem:[%s2173_s29] sm:$0xff]  ;;  %v307_v7 = vld [vmem:[%s2173_s29 + $0x8] sm:$0xff]  ;;  %v308_v9 = vld [vmem:[%s2173_s29 + $0x10] sm:$0xff]  ;;  %1320 = vmatprep.subr.bf16.mxu0 %v1705_v0 }
  0xdb   :  { %v1312_v8 = vpack.c.bf16 %v307_v7, %v306_v6  ;;  %v309_v10 = vld [vmem:[%s2173_s29 + $0x18] sm:$0xff] }
  0xdc   :  { %v1315_v11 = vpack.c.bf16 %v309_v10, %v308_v9  ;;  %v1172_v10 = vld [vmem:[#allocation10 + $0x1] ss:$0 sm:$0xff] }
  0xdd   :  { %1313 = vmatpush3.bf16.msra.mxu1 %v1312_v8  ;;  %1322 = vmatpush3.bf16.msra.mxu0 %v1321_v47  ;;  %v1171_v8 = vld [vmem:[#allocation10] ss:$0 sm:$0xff] }
  0xde   :  { %1314 = vmatprep.subr.bf16.mxu1 %v1705_v0  ;;  %1269 = vmatprep.subr.mxu0 %v1707_v1 }
  0xe1   :  { %1316 = vmatpush3.bf16.msra.mxu1 %v1315_v11 }
  0xe2   :  { %1323 = vmatprep.subr.bf16.mxu1 %v1705_v0 }
 0x1ac   :  { %v259_v12 = vpop.f32.mrb[0].mxu1 }
 0x1ad   :  { %v264_v13 = vsel %vm263_vm5, %v259_v12, 0.0  ;;  %v1235_v14 = vpop.f32.mrb[1].mxu1 }
 0x1ae   :  { %v265_v15 = vrot.slane %v264_v13, 4 }
 0x1b0   :  { %v266_v16 = vadd.f32 %v265_v15, %v264_v13 }
 0x1b2   :  { %v267_v17 = vrot.slane %v266_v16, 2 }
 0x1b4   :  { %v268_v18 = vadd.f32 %v267_v17, %v266_v16  ;;  %v542_v16 = vld [vmem:[%s2146_s8] sm:$0xff]  ;;  %v543_v17 = vld [vmem:[%s2146_s8 + $0x8] sm:$0xff] }
 0x1b6   :  { %v269_v19 = vrot.slane %v268_v18, 1 }
 0x1b8   :  { %v270_v20 = vadd.f32 %v269_v19, %v268_v18  ;;  %v1324_v18 = vpack.c.bf16 %v543_v17, %v542_v16  ;;  %v544_v19 = vld [vmem:[%s2146_s8 + $0x10] sm:$0xff] }
 0x1ba   :  { %v272_v21 = vmul.f32 0.125, %v270_v20  ;;  %v545_v20 = vld [vmem:[%s2146_s8 + $0x18] sm:$0xff]  ;;  %s1709_s8 = smov 120  }
 0x1bc   :  { %v273_v22 = vsub.f32 %v259_v12, %v272_v21  ;;  %v1173_v12 = vld [vmem:[#allocation10 + $0x2] ss:$0 sm:$0xff]  ;;  %v1327_v21 = vpack.c.bf16 %v545_v20, %v544_v19 }
 0x1be   :  { %v274_v23 = vmul.f32 %v273_v22, %v273_v22 }
 0x1c0   :  { %v275_v24 = vsel %vm263_vm5, %v274_v23, 0.0 }
 0x1c1   :  { %v276_v25 = vrot.slane %v275_v24, 4 }
 0x1c3   :  { %v277_v26 = vadd.f32 %v276_v25, %v275_v24 }
 0x1c5   :  { %v278_v27 = vrot.slane %v277_v26, 2 }
 0x1c7   :  { %v279_v28 = vadd.f32 %v278_v27, %v277_v26 }
 0x1c9   :  { %v280_v29 = vrot.slane %v279_v28, 1 }
 0x1cb   :  { %v281_v30 = vadd.f32 %v280_v29, %v279_v28 }
 0x1cd   :  { %v282_v31 = vmul.f32 0.125, %v281_v30 }
 0x1cf   :  { %v283_v32 = vadd.f32 1e-05, %v282_v31 }
 0x1d1   :  { %1369 = vrsqrt.f32 %v283_v32 }
 0x1db   :  { %v1370_v33 = vpop.eup %1369 }
 0x1dc   :  { %v285_v35 = vmul.f32 %v1370_v33, %v273_v22 }
 0x1de   :  { %v291_v37 = vmul.f32 %v1167_v34, %v285_v35 }
 0x1e0   :  { %v297_v39 = vadd.f32 %v1168_v36, %v291_v37 }
 0x1e2   :  { %vm298_vm6 = vcmp.ge.f32.partialorder %v297_v39, 0.0  ;;  %v304_v40 = vmul.f32 %v1169_v38, %v297_v39 }
 0x1e4   :  { %v305_v41 = vsel %vm298_vm6, %v297_v39, %v304_v40 }
 0x1e5   :  { %1245 = vmatmul.mubr.msk.f32.vlgmr.msra.gmra.mrb[2].mxu1 %vm263_vm5, %v305_v41 }
 0x1e6   :  { %1266 = vmatprep.mubr.msk.f32.mxu1 %vm1706_vm0, %v1707_v1  ;;  %1325 = vmatpush3.bf16.msra.mxu1 %v1324_v18 }
 0x1e7   :  { %1326 = vmatprep.subr.bf16.mxu1 %v1705_v0 }
 0x1ea   :  { %1328 = vmatpush3.bf16.msra.mxu1 %v1327_v21 }
 0x1eb   :  { %1335 = vmatprep.subr.bf16.mxu1 %v1705_v0 }
 0x2b8   :  { %v379_v48 = vpop.f32.mrb[2].mxu1 }
 0x2b9   :  { %v383_v49 = vsel %vm263_vm5, %v379_v48, 0.0  ;;  %v1246_v50 = vpop.f32.mrb[3].mxu1 }
 0x2ba   :  { %v384_v51 = vrot.slane %v383_v49, 4 }
 0x2bc   :  { %v385_v52 = vadd.f32 %v384_v51, %v383_v49 }
 0x2be   :  { %v386_v53 = vrot.slane %v385_v52, 2 }
 0x2c0   :  { %v387_v54 = vadd.f32 %v386_v53, %v385_v52  ;;  %v1178_v52 = vld [vmem:[#allocation13] ss:$0 sm:$0xff] }
 0x2c2   :  { %v388_v55 = vrot.slane %v387_v54, 1 }
 0x2c4   :  { %v389_v56 = vadd.f32 %v388_v55, %v387_v54 }
 0x2c6   :  { %v390_v57 = vmul.f32 0.125, %v389_v56 }
 0x2c8   :  { %v391_v58 = vsub.f32 %v379_v48, %v390_v57  ;;  %v1177_v48 = vld [vmem:[#allocation11 + $0x2] ss:$0 sm:$0xff] }
 0x2ca   :  { %v392_v59 = vmul.f32 %v391_v58, %v391_v58 }
 0x2cc   :  { %v393_v60 = vsel %vm263_vm5, %v392_v59, 0.0 }
 0x2cd   :  { %v394_v61 = vrot.slane %v393_v60, 4 }
 0x2cf   :  { %v395_v62 = vadd.f32 %v394_v61, %v393_v60  ;;  %v633_v60 = vld [vmem:[#allocation5] sm:$0xff] }
 0x2d1   :  { %v396_v63 = vrot.slane %v395_v62, 2 }
 0x2d3   :  { %v397_v2 = vadd.f32 %v396_v63, %v395_v62 }
 0x2d5   :  { %v398_v3 = vrot.slane %v397_v2, 1 }
 0x2d7   :  { %v399_v4 = vadd.f32 %v398_v3, %v397_v2  ;;  %v758_v2 = vld [vmem:[%s2150_s12] sm:$0xff]  ;;  %v759_v3 = vld [vmem:[%s2150_s12 + $0x8] sm:$0xff] }
 0x2d9   :  { %v400_v5 = vmul.f32 0.125, %v399_v4  ;;  %v1330_v4 = vpack.c.bf16 %v759_v3, %v758_v2 }
 0x2db   :  { %v401_v6 = vadd.f32 1e-05, %v400_v5  ;;  %v760_v5 = vld [vmem:[%s2150_s12 + $0x10] sm:$0xff] }
 0x2dd   :  { %1371 = vrsqrt.f32 %v401_v6  ;;  %v761_v6 = vld [vmem:[%s2150_s12 + $0x18] sm:$0xff]  ;;  %s1134_s12 = sshll.u32 %s1712_s0, 4  ;;  %s1135_s12 = int_to_ptr.vmem [resolvable:$true] %s1134_s12 }
 0x2de   :  { %s1611_s24 = scalar_lea.vmem %s1135_s12, 128  ;;  %p1616_p11 = scmp.lt.s32.totalorder %s1135_s12, %s1135_s12 }
 0x2df   :  { %p1612_p10 = scmp.ne.s32.totalorder %s1135_s12, %s1611_s24  ;;  %p1617_p12 = scmp.lt.s32.totalorder %s1611_s24, %s1611_s24 }
 0x2e1   :  { %p1618_p13 = por %p1617_p12, %p1616_p11 }
 0x2e3   :  { %p1619_p0 = pnand %p1618_p13, %p1612_p10 }
 0x2e7   :  { %v1372_v7 = vpop.eup %1371 }
 0x2e8   :  { %v403_v9 = vmul.f32 %v1372_v7, %v391_v58  ;;  %v643_v58 = vld [vmem:[#allocation14] sm:$0xff]  ;;  %v1333_v7 = vpack.c.bf16 %v761_v6, %v760_v5  ;;  %v1186_v6 = vld [vmem:[#allocation17 + $0x1] ss:$0 sm:$0xff] }
 0x2ea   :  { %v409_v11 = vmul.f32 %v1171_v8, %v403_v9 }
 0x2ec   :  { %v415_v13 = vadd.f32 %v1172_v10, %v409_v11 }
 0x2ee   :  { %vm416_vm7 = vcmp.ge.f32.partialorder %v415_v13, 0.0  ;;  %v422_v14 = vmul.f32 %v1173_v12, %v415_v13 }
 0x2f0   :  { %v423_v15 = vsel %vm416_vm7, %v415_v13, %v422_v14 }
 0x2f1   :  { %1256 = vmatmul.mubr.msk.f32.vlgmr.msra.gmra.mrb[0].mxu0 %vm263_vm5, %v423_v15 }
 0x2f2   :  { %1271 = vmatprep.mubr.msk.f32.mxu0 %vm1706_vm0, %v1707_v1  ;;  %1270 = vmatpush3.msra.mxu0 %v643_v58 }
 0x2f3   :  { %1329 = vmatprep.subr.bf16.mxu0 %v1705_v0 }
 0x3c4   :  { %v497_v22 = vpop.f32.mrb[0].mxu0 }
 0x3c5   :  { %v501_v23 = vsel %vm263_vm5, %v497_v22, 0.0  ;;  %v1257_v24 = vpop.f32.mrb[1].mxu0 }
 0x3c6   :  { %v502_v25 = vrot.slane %v501_v23, 4 }
 0x3c8   :  { %v503_v26 = vadd.f32 %v502_v25, %v501_v23 }
 0x3ca   :  { %v504_v27 = vrot.slane %v503_v26, 2 }
 0x3cc   :  { %v505_v28 = vadd.f32 %v504_v27, %v503_v26 }
 0x3ce   :  { %v506_v29 = vrot.slane %v505_v28, 1 }
 0x3d0   :  { %v507_v30 = vadd.f32 %v506_v29, %v505_v28 }
 0x3d2   :  { %v508_v31 = vmul.f32 0.125, %v507_v30  ;;  %v1181_v30 = vld [vmem:[#allocation16] ss:$0 sm:$0xff] }
 0x3d4   :  { %v509_v32 = vsub.f32 %v497_v22, %v508_v31 }
 0x3d6   :  { %v510_v33 = vmul.f32 %v509_v32, %v509_v32 }
 0x3d8   :  { %v511_v34 = vsel %vm263_vm5, %v510_v33, 0.0 }
 0x3d9   :  { %v512_v35 = vrot.slane %v511_v34, 4 }
 0x3db   :  { %v513_v36 = vadd.f32 %v512_v35, %v511_v34  ;;  %v1183_v34 = vld [vmem:[#allocation16 + $0x2] ss:$0 sm:$0xff] }
 0x3dd   :  { %v514_v37 = vrot.slane %v513_v36, 2 }
 0x3df   :  { %v515_v38 = vadd.f32 %v514_v37, %v513_v36 }
 0x3e1   :  { %v516_v39 = vrot.slane %v515_v38, 1 }
 0x3e3   :  { %v517_v40 = vadd.f32 %v516_v39, %v515_v38  ;;  %v876_v38 = vld [vmem:[%s2152_s14] sm:$0xff]  ;;  %v877_v39 = vld [vmem:[%s2152_s14 + $0x8] sm:$0xff] }
 0x3e5   :  { %v518_v41 = vmul.f32 0.125, %v517_v40  ;;  %v1336_v40 = vpack.c.bf16 %v877_v39, %v876_v38  ;;  %v1189_v39 = vld [vmem:[%s2153_s15] ss:$0 sm:$0xff] }
 0x3e7   :  { %v519_v42 = vadd.f32 1e-05, %v518_v41  ;;  %v878_v41 = vld [vmem:[%s2152_s14 + $0x10] sm:$0xff] }
 0x3e9   :  { %1373 = vrsqrt.f32 %v519_v42 }
 0x3f3   :  { %v1374_v43 = vpop.eup %1373 }
 0x3f4   :  { %v521_v45 = vmul.f32 %v1374_v43, %v509_v32  ;;  %v1182_v32 = vld [vmem:[#allocation16 + $0x1] ss:$0 sm:$0xff] }
 0x3f6   :  { %v527_v47 = vmul.f32 %v1175_v44, %v521_v45 }
 0x3f8   :  { %v533_v49 = vadd.f32 %v1176_v46, %v527_v47 }
 0x3fa   :  { %vm534_vm8 = vcmp.ge.f32.partialorder %v533_v49, 0.0  ;;  %v540_v50 = vmul.f32 %v1177_v48, %v533_v49 }
 0x3fc   :  { %v541_v51 = vsel %vm534_vm8, %v533_v49, %v540_v50 }
 0x3fd   :  { %1267 = vmatmul.mubr.msk.f32.vlgmr.msra.gmra.mrb[4].mxu1 %vm263_vm5, %v541_v51 }
 0x3fe   :  { %1293 = vmatprep.mubr.msk.f32.mxu1 %vm1706_vm0, %v1707_v1  ;;  %1337 = vmatpush3.bf16.msra.mxu1 %v1336_v40 }
 0x3ff   :  { %1338 = vmatprep.subr.bf16.mxu1 %v1705_v0 }
 0x4d0   :  { %v622_v53 = vpop.f32.mrb[4].mxu1 }
 0x4d1   :  { %v2013_v54 = vadd.f32 %v1178_v52, %v622_v53  ;;  %v1268_v55 = vpop.f32.mrb[5].mxu1 }
 0x4d3   :  { %v634_v56 = vmul.f32 0.5, %v2013_v54  ;;  %627 = vst.msk [vmem:[#allocation20] sm:$0xff] %vm626_vm9, %v2013_v54 }
 0x4d5   :  { %v635_v57 = vmul.f32 1.442695, %v634_v56 }
 0x4d7   :  { %1375 = vpow2.f32 %v635_v57 }
 0x4e1   :  { %v1376_v59 = vpop.eup %1375 }
 0x4e2   :  { %638 = vrot.lane.b32.xlu0 %v1376_v59, %s1709_s8 }
 0x554   :  { %v639_v61 = vpop.permute.xlu0 %638 }
 0x555   :  { %v641_v62 = vmul.f32 %v639_v61, %v633_v60 }
 0x557   :  { %v642_v63 = vadd.f32 %v641_v62, %v2013_v54 }
 0x559   :  { %1272 = vmatmul.mubr.msk.f32.vlgmr.msra.gmra.mrb[2].mxu0 %vm626_vm9, %v642_v63 }
 0x55a   :  { %1282 = vmatprep.mubr.msk.f32.mxu0 %vm1706_vm0, %v1707_v1  ;;  %1331 = vmatpush3.bf16.msra.mxu0 %v1330_v4  ;;  %v1185_v4 = vld [vmem:[#allocation17] ss:$0 sm:$0xff] }
 0x55b   :  { %1332 = vmatprep.subr.bf16.mxu0 %v1705_v0 }
 0x55e   :  { %1334 = vmatpush3.bf16.msra.mxu0 %v1333_v7 }
 0x55f   :  { %1341 = vmatprep.subr.bf16.mxu0 %v1705_v0 }
 0x62c   :  { %v713_v8 = vpop.f32.mrb[2].mxu0 }
 0x62d   :  { %v717_v9 = vsel %vm263_vm5, %v713_v8, 0.0  ;;  %v1273_v10 = vpop.f32.mrb[3].mxu0 }
 0x62e   :  { %v718_v11 = vrot.slane %v717_v9, 4 }
 0x630   :  { %v719_v12 = vadd.f32 %v718_v11, %v717_v9 }
 0x632   :  { %v720_v13 = vrot.slane %v719_v12, 2 }
 0x634   :  { %v721_v14 = vadd.f32 %v720_v13, %v719_v12  ;;  %v994_v12 = vld [vmem:[%s2154_s16] sm:$0xff]  ;;  %v995_v13 = vld [vmem:[%s2154_s16 + $0x8] sm:$0xff] }
 0x636   :  { %v722_v15 = vrot.slane %v721_v14, 1 }
 0x638   :  { %v723_v16 = vadd.f32 %v722_v15, %v721_v14  ;;  %v1342_v14 = vpack.c.bf16 %v995_v13, %v994_v12  ;;  %v996_v15 = vld [vmem:[%s2154_s16 + $0x10] sm:$0xff] }
 0x63a   :  { %v724_v17 = vmul.f32 0.125, %v723_v16  ;;  %v997_v16 = vld [vmem:[%s2154_s16 + $0x18] sm:$0xff] }
 0x63c   :  { %v725_v18 = vsub.f32 %v713_v8, %v724_v17  ;;  %v1187_v8 = vld [vmem:[#allocation17 + $0x2] ss:$0 sm:$0xff]  ;;  %v1345_v17 = vpack.c.bf16 %v997_v16, %v996_v15 }
 0x63e   :  { %v726_v19 = vmul.f32 %v725_v18, %v725_v18 }
 0x640   :  { %v727_v20 = vsel %vm263_vm5, %v726_v19, 0.0 }
 0x641   :  { %v728_v21 = vrot.slane %v727_v20, 4 }
 0x643   :  { %v729_v22 = vadd.f32 %v728_v21, %v727_v20 }
 0x645   :  { %v730_v23 = vrot.slane %v729_v22, 2 }
 0x647   :  { %v731_v24 = vadd.f32 %v730_v23, %v729_v22 }
 0x649   :  { %v732_v25 = vrot.slane %v731_v24, 1 }
 0x64b   :  { %v733_v26 = vadd.f32 %v732_v25, %v731_v24 }
 0x64d   :  { %v734_v27 = vmul.f32 0.125, %v733_v26 }
 0x64f   :  { %v735_v28 = vadd.f32 1e-05, %v734_v27 }
 0x651   :  { %1377 = vrsqrt.f32 %v735_v28 }
 0x65b   :  { %v1378_v29 = vpop.eup %1377 }
 0x65c   :  { %v737_v31 = vmul.f32 %v1378_v29, %v725_v18 }
 0x65e   :  { %v743_v33 = vmul.f32 %v1181_v30, %v737_v31 }
 0x660   :  { %v749_v35 = vadd.f32 %v1182_v32, %v743_v33 }
 0x662   :  { %vm750_vm10 = vcmp.ge.f32.partialorder %v749_v35, 0.0  ;;  %v756_v36 = vmul.f32 %v1183_v34, %v749_v35 }
 0x664   :  { %v757_v37 = vsel %vm750_vm10, %v749_v35, %v756_v36 }
 0x665   :  { %1283 = vmatmul.mubr.msk.f32.vlgmr.msra.gmra.mrb[4].mxu0 %vm263_vm5, %v757_v37 }
 0x666   :  { %1304 = vmatprep.mubr.msk.f32.mxu0 %vm1706_vm0, %v1707_v1  ;;  %v879_v1 = vld [vmem:[%s2152_s14 + $0x18] sm:$0xff]  ;;  %1343 = vmatpush3.bf16.msra.mxu0 %v1342_v14  ;;  %vm1091_vm0 = vcmask 23552  }
 0x667   :  { %v1339_v42 = vpack.c.bf16 %v879_v1, %v878_v41  ;;  %1344 = vmatprep.subr.bf16.mxu0 %v1705_v0  ;;  %v1190_v41 = vld [vmem:[%s2153_s15 + $0x1] ss:$0 sm:$0xff] }
 0x669   :  { %1340 = vmatpush3.bf16.msra.mxu1 %v1339_v42  ;;  %v1191_v42 = vld [vmem:[%s2153_s15 + $0x2] ss:$0 sm:$0xff]  ;;  %s1710_s15 = smov 124  }
 0x66a   :  { %1346 = vmatpush3.bf16.msra.mxu0 %v1345_v17 }
 0x738   :  { %v831_v43 = vpop.f32.mrb[4].mxu0 }
 0x739   :  { %v835_v44 = vsel %vm263_vm5, %v831_v43, 0.0  ;;  %v1284_v45 = vpop.f32.mrb[5].mxu0 }
 0x73a   :  { %v836_v46 = vrot.slane %v835_v44, 4 }
 0x73c   :  { %v837_v47 = vadd.f32 %v836_v46, %v835_v44  ;;  %v1192_v46 = vld [vmem:[%s2155_s17] ss:$0 sm:$0xff]  ;;  %s1711_s17 = smov 121  }
 0x73e   :  { %v838_v48 = vrot.slane %v837_v47, 2 }
 0x740   :  { %v839_v49 = vadd.f32 %v838_v48, %v837_v47 }
 0x742   :  { %v840_v50 = vrot.slane %v839_v49, 1 }
 0x744   :  { %v841_v51 = vadd.f32 %v840_v50, %v839_v49 }
 0x746   :  { %v842_v52 = vmul.f32 0.125, %v841_v51 }
 0x748   :  { %v843_v53 = vsub.f32 %v831_v43, %v842_v52 }
 0x74a   :  { %v844_v55 = vmul.f32 %v843_v53, %v843_v53 }
 0x74c   :  { %v845_v56 = vsel %vm263_vm5, %v844_v55, 0.0 }
 0x74d   :  { %v846_v57 = vrot.slane %v845_v56, 4 }
 0x74f   :  { %v847_v58 = vadd.f32 %v846_v57, %v845_v56 }
 0x751   :  { %v848_v59 = vrot.slane %v847_v58, 2 }
 0x753   :  { %v849_v60 = vadd.f32 %v848_v59, %v847_v58 }
 0x755   :  { %v850_v61 = vrot.slane %v849_v60, 1 }
 0x757   :  { %v851_v62 = vadd.f32 %v850_v61, %v849_v60 }
 0x759   :  { %v852_v63 = vmul.f32 0.125, %v851_v62 }
 0x75b   :  { %v853_v2 = vadd.f32 1e-05, %v852_v63 }
 0x75d   :  { %1379 = vrsqrt.f32 %v853_v2 }
 0x767   :  { %v1380_v3 = vpop.eup %1379 }
 0x768   :  { %v855_v5 = vmul.f32 %v1380_v3, %v843_v53 }
 0x76a   :  { %v861_v7 = vmul.f32 %v1185_v4, %v855_v5 }
 0x76c   :  { %v867_v9 = vadd.f32 %v1186_v6, %v861_v7 }
 0x76e   :  { %vm868_vm11 = vcmp.ge.f32.partialorder %v867_v9, 0.0  ;;  %v874_v10 = vmul.f32 %v1187_v8, %v867_v9 }
 0x770   :  { %v875_v11 = vsel %vm868_vm11, %v867_v9, %v874_v10 }
 0x771   :  { %1294 = vmatmul.mubr.msk.f32.vlgmr.msra.gmra.mrb[6].mxu1 %vm263_vm5, %v875_v11 }
 0x844   :  { %v949_v18 = vpop.f32.mrb[6].mxu1 }
 0x845   :  { %v953_v19 = vsel %vm263_vm5, %v949_v18, 0.0  ;;  %v1295_v20 = vpop.f32.mrb[7].mxu1 }
 0x846   :  { %v954_v21 = vrot.slane %v953_v19, 4 }
 0x848   :  { %v955_v22 = vadd.f32 %v954_v21, %v953_v19 }
 0x84a   :  { %v956_v23 = vrot.slane %v955_v22, 2 }
 0x84c   :  { %v957_v24 = vadd.f32 %v956_v23, %v955_v22 }
 0x84e   :  { %v958_v25 = vrot.slane %v957_v24, 1 }
 0x850   :  { %v959_v0 = vadd.f32 %v958_v25, %v957_v24 }
 0x852   :  { %v960_v26 = vmul.f32 0.125, %v959_v0 }
 0x854   :  { %v961_v27 = vsub.f32 %v949_v18, %v960_v26 }
 0x856   :  { %v962_v28 = vmul.f32 %v961_v27, %v961_v27 }
 0x858   :  { %v963_v29 = vsel %vm263_vm5, %v962_v28, 0.0 }
 0x859   :  { %v964_v30 = vrot.slane %v963_v29, 4 }
 0x85b   :  { %v965_v31 = vadd.f32 %v964_v30, %v963_v29 }
 0x85d   :  { %v966_v32 = vrot.slane %v965_v31, 2 }
 0x85f   :  { %v967_v33 = vadd.f32 %v966_v32, %v965_v31 }
 0x861   :  { %v968_v34 = vrot.slane %v967_v33, 1 }
 0x863   :  { %v969_v35 = vadd.f32 %v968_v34, %v967_v33 }
 0x865   :  { %v970_v36 = vmul.f32 0.125, %v969_v35 }
 0x867   :  { %v971_v37 = vadd.f32 1e-05, %v970_v36 }
 0x869   :  { %1381 = vrsqrt.f32 %v971_v37 }
 0x873   :  { %v1382_v38 = vpop.eup %1381 }
 0x874   :  { %v973_v40 = vmul.f32 %v1382_v38, %v961_v27 }
 0x876   :  { %v979_v1 = vmul.f32 %v1189_v39, %v973_v40 }
 0x878   :  { %v985_v43 = vadd.f32 %v1190_v41, %v979_v1 }
 0x87a   :  { %vm986_vm12 = vcmp.ge.f32.partialorder %v985_v43, 0.0  ;;  %v992_v44 = vmul.f32 %v1191_v42, %v985_v43 }
 0x87c   :  { %v993_v45 = vsel %vm986_vm12, %v985_v43, %v992_v44 }
 0x87d   :  { %1305 = vmatmul.mubr.msk.f32.vlgmr.msra.gmra.mrb[6].mxu0 %vm263_vm5, %v993_v45 }
 0x950   :  { %v1074_v47 = vpop.f32.mrb[6].mxu0 }
 0x951   :  { %v1075_v48 = vadd.f32 %v1192_v46, %v1074_v47  ;;  %v1306_v49 = vpop.f32.mrb[7].mxu0 }
 0x953   :  { %v1100_v50 = vsel %vm1099_vm13, %v1075_v48, -inf  ;;  %v1081_v51 = vsel %vm1080_vm14, %v1075_v48, -inf  ;;  %1079 = vst.msk [vmem:[#allocation19] sm:$0xff] %vm1078_vm15, %v1075_v48 }
 0x954   :  { %1101 = vmax.xlane.f32.xlu1 %v1100_v50  ;;  %1082 = vmax.xlane.f32.xlu0 %v1081_v51 }
 0x9e1   :  { %v1102_v52 = vpop.xlane.xlu1 %1101  ;;  %v1083_v53 = vpop.xlane.xlu0 %1082 }
 0x9e2   :  { %v2089_v55 = vsub.f32 %v1075_v48, %v1083_v53  ;;  %v2091_v56 = vsub.f32 %v1075_v48, %v1102_v52 }
 0x9e4   :  { %v1085_v57 = vmul.f32 1.442695, %v2089_v55  ;;  %v1104_v58 = vmul.f32 1.442695, %v2091_v56 }
 0x9e6   :  { %1383 = vpow2.f32 %v1085_v57 }
 0x9e7   :  { %1385 = vpow2.f32 %v1104_v58 }
 0x9f0   :  { %v1384_v59 = vpop.eup %1383 }
 0x9f1   :  { %1088 = vrot.lane.b32.xlu1 %v1384_v59, %s1710_s15  ;;  %v1386_v60 = vpop.eup %1385 }
 0x9f5   :  { %1107 = vrot.lane.b32.xlu1 %v1386_v60, %s1711_s17 }
 0xa63   :  { %v1089_v61 = vpop.permute.xlu1 %1088 }
 0xa64   :  { %v1092_v62 = vsel %vm1091_vm0, %v1089_v61, 0.0 }
 0xa65   :  { %1093 = vadd.xlane.f32.xlu1 %v1092_v62 }
 0xa67   :  { %v1108_v63 = vpop.permute.xlu1 %1107 }
 0xa68   :  { %v1111_v2 = vsel %vm1110_vm1, %v1108_v63, 0.0 }
 0xa69   :  { %1112 = vadd.xlane.f32.xlu0 %v1111_v2 }
 0xa7f   :  { %629 = vrot.lane.b32.xlu0 %v2013_v54, %s1709_s8 }
 0xa80   :  { %1622 = shalt.err (!%p1619_p0)
}
 0xa81   :  { %s1623_s5 = scalar_lea.hbm %s2157_s19, 128 }
 0xa82   :  { %p1624_p1 = scmp.ne.s32.totalorder %s2157_s19, %s1623_s5  ;;  %p1627_p2 = scmp.lt.u32.totalorder %s1623_s5, %s2157_s19 }
 0xa84   :  { %p1629_p3 = pnand %p1627_p2, %p1624_p1 }
 0xa86   :  { %1632 = shalt.err (!%p1629_p3)
}
 0xa87   :  { %1137 = dma.vmem_to_hbm [thread:$0]  %s1135_s12, 128, %s2157_s19, [#allocation21]  }
 0xa88   :  { %s1713_s4 = smov [#allocation22]  }
 0xa89   :  { %s1144_s11 = sshll.u32 %s1713_s4, 4  ;;  %s1145_s11 = int_to_ptr.vmem [resolvable:$true] %s1144_s11 }
 0xa8a   :  { %s1633_s23 = scalar_lea.vmem %s1145_s11, 128  ;;  %p1638_p5 = scmp.lt.s32.totalorder %s1145_s11, %s1145_s11 }
 0xa8b   :  { %p1634_p4 = scmp.ne.s32.totalorder %s1145_s11, %s1633_s23  ;;  %p1639_p6 = scmp.lt.s32.totalorder %s1633_s23, %s1633_s23 }
 0xa8d   :  { %p1640_p7 = por %p1639_p6, %p1638_p5 }
 0xa8f   :  { %p1641_p8 = pnand %p1640_p7, %p1634_p4 }
 0xaf2   :  { %v1094_v54 = vpop.xlane.xlu1 %1093 }
 0xaf3   :  { %1387 = vlog2.f32 %v1094_v54 }
 0xaf6   :  { %v1113_v3 = vpop.xlane.xlu0 %1112 }
 0xaf7   :  { %1389 = vlog2.f32 %v1113_v3 }
 0xafa   :  { %v630_v4 = vpop.permute.xlu0 %629 }
 0xafb   :  { %632 = vst.msk [vmem:[#allocation22] sm:$0xff] %vm626_vm9, %v630_v4 }
 0xafc   :  { %1644 = shalt.err (!%p1641_p8)
}
 0xafd   :  { %s1645_s19 = scalar_lea.hbm %s2158_s20, 128 }
 0xafe   :  { %p1646_p9 = scmp.ne.s32.totalorder %s2158_s20, %s1645_s19  ;;  %p1649_p10 = scmp.lt.u32.totalorder %s1645_s19, %s2158_s20 }
 0xb00   :  { %p1651_p11 = pnand %p1649_p10, %p1646_p9 }
 0xb02   :  { %1654 = shalt.err (!%p1651_p11)
}
 0xb03   :  { %1147 = dma.vmem_to_hbm [thread:$0]  %s1145_s11, 128, %s2158_s20, [#allocation21]   ;;  %v1388_v5 = vpop.eup %1387 }
 0xb04   :  { %v1096_v6 = vmul.f32 0.6931472, %v1388_v5  ;;  %v1390_v8 = vpop.eup %1389  ;;  %s1714_s26 = smov [#allocation19]  }
 0xb05   :  { %s1124_s9 = sshll.u32 %s1714_s26, 4  ;;  %v1115_v9 = vmul.f32 0.6931472, %v1390_v8  ;;  %s1125_s9 = int_to_ptr.vmem [resolvable:$true] %s1124_s9 }
 0xb06   :  { %v1097_v7 = vsub.f32 %v2089_v55, %v1096_v6  ;;  %s1655_s7 = scalar_lea.vmem %s1125_s9, 128  ;;  %p1660_p13 = scmp.lt.s32.totalorder %s1125_s9, %s1125_s9 }
 0xb07   :  { %v1116_v10 = vsub.f32 %v2091_v56, %v1115_v9  ;;  %p1656_p12 = scmp.ne.s32.totalorder %s1125_s9, %s1655_s7  ;;  %p1661_p0 = scmp.lt.s32.totalorder %s1655_s7, %s1655_s7 }
 0xb08   :  { %1098 = vst.msk [vmem:[#allocation19] sm:$0xff] %vm1080_vm14, %v1097_v7 }
 0xb09   :  { %1117 = vst.msk [vmem:[#allocation19] sm:$0xff] %vm1099_vm13, %v1116_v10  ;;  %p1662_p1 = por %p1661_p0, %p1660_p13 }
 0xb0b   :  { %p1663_p2 = pnand %p1662_p1, %p1656_p12 }
 0xb0d   :  { %1666 = shalt.err (!%p1663_p2)
}
 0xb0e   :  { %s1667_s17 = scalar_lea.hbm %s2156_s18, 128 }
 0xb0f   :  { %p1668_p3 = scmp.ne.s32.totalorder %s2156_s18, %s1667_s17  ;;  %p1671_p4 = scmp.lt.u32.totalorder %s1667_s17, %s2156_s18 }
 0xb11   :  { %p1673_p5 = pnand %p1671_p4, %p1668_p3 }
 0xb13   :  { %1676 = shalt.err (!%p1673_p5)
}
 0xb14   :  { %1127 = dma.vmem_to_hbm [thread:$0]  %s1125_s9, 128, %s2156_s18, [#allocation4]  }
 0xb15   :  { %1689 = dma.done.wait [#allocation4], 128  }
 0xb16   :  { %1690 = vsyncadd [#allocation4], 4294967168 }
 0xb17   :  { %1691 = dma.done.wait [#allocation21], 256  }
 0xb18   :  { %1692 = vsyncadd [#allocation21], 4294967040 }
 0xb19   :  { %1157 = vsyncpa [#allocation3], 1 }
 0xb1a   :  { %1158 = vsyncpa [#allocation6], 1 }
 0xb1b   :  { %1159 = vsyncpa [#allocation9], 1 }
 0xb1c   :  { %1160 = vsyncpa [#allocation12], 1 }
 0xb1d   :  { %1161 = vsyncpa [#allocation15], 1 }
 0xb1e   :  { %1162 = vsyncpa [#allocation18], 1 }
 0xb1f   :  { %1163 = vsyncpa [#allocation4], 1 }
 0xb20   :  { %1164 = vsyncpa [#allocation21], 1 }

</bundles_post_ra>
